<compile_context>
chip_gen: v7x
topology: tpu7x:2x2x1
jax: 0.10.0
libtpu: 0.0.40
codegen_flags: <defaults>
</compile_context>

<pallas_src>
import functools
import math

import jax
import jax.numpy as jnp
from jax.experimental import pallas as pl
from jax.experimental.pallas import tpu as pltpu


def _layernorm(x, gamma, beta, eps=1e-5):
    mu = jnp.mean(x, axis=-1, keepdims=True)
    var = jnp.mean((x - mu) ** 2, axis=-1, keepdims=True)
    return (x - mu) * jax.lax.rsqrt(var + eps) * gamma + beta


def fused_resampler_kernel(
    lat_ref, xf_ref,
    wq_ref, wk_ref, wv_ref, bq_ref, bk_ref, bv_ref, wo_ref, bo_ref,
    g_attn_ref, b_attn_ref,
    w1_ref, b1_ref, w2_ref, b2_ref,
    g_ffw_ref, b_ffw_ref,
    o_ref,
    carry_ref,
    *, num_heads,
):
    f32 = jnp.float32
    layer = pl.program_id(1)

    # Layer 0 of each batch element: (re-)initialize the VMEM-resident latent
    # carry from the (un-broadcast) learned latents.
    @pl.when(layer == 0)
    def _():
        carry_ref[...] = lat_ref[...]

    cdt = carry_ref.dtype                      # bf16 compute dtype for MXU inputs
    x_b = carry_ref[...]                       # (L, d)  latents (bf16)
    xf_b = xf_ref[0]                           # (S, d)  visual features (bf16)
    L, d = x_b.shape
    hd = d // num_heads
    scale = 1.0 / math.sqrt(hd)

    wq = wq_ref[0]; wk = wk_ref[0]; wv = wv_ref[0]; wo = wo_ref[0]   # (d, d) bf16
    bq = bq_ref[0].astype(f32); bk = bk_ref[0].astype(f32)
    bv = bv_ref[0].astype(f32); bo = bo_ref[0].astype(f32)           # (1, d) f32

    # ---- projections: bf16 x bf16 -> f32 accumulation on the MXU ----
    # Attention scale folded into q (cheaper than scaling the (L, S+L) scores).
    q = ((jnp.dot(x_b, wq, preferred_element_type=f32) + bq) * scale).astype(cdt)
    # k / v computed separately for visual features and latents: no kv concat.
    k_f = (jnp.dot(xf_b, wk, preferred_element_type=f32) + bk).astype(cdt)   # (S, d)
    k_x = (jnp.dot(x_b,  wk, preferred_element_type=f32) + bk).astype(cdt)   # (L, d)
    v_f = (jnp.dot(xf_b, wv, preferred_element_type=f32) + bv).astype(cdt)   # (S, d)
    v_x = (jnp.dot(x_b,  wv, preferred_element_type=f32) + bv).astype(cdt)   # (L, d)

    # ---- multi-head attention, joint softmax over keys [x_f ; x] ----
    # concat_h(head_h) @ Wo  ==  sum_h head_h @ Wo[h*hd:(h+1)*hd, :]
    # TODO(synk): for production S (hundreds of visual tokens) tile the kv
    # sequence with an extra 'arbitrary' grid axis + online softmax.
    attn = jnp.zeros((L, d), f32)
    for h in range(num_heads):                 # static unroll over heads
        sl = slice(h * hd, (h + 1) * hd)
        qh = q[:, sl]
        s_f = jnp.einsum("ld,td->lt", qh, k_f[:, sl], preferred_element_type=f32)  # (L, S)
        s_x = jnp.einsum("ld,td->lt", qh, k_x[:, sl], preferred_element_type=f32)  # (L, L)
        m = jnp.maximum(jnp.max(s_f, axis=-1, keepdims=True),
                        jnp.max(s_x, axis=-1, keepdims=True))
        p_f = jnp.exp(s_f - m)
        p_x = jnp.exp(s_x - m)
        inv = pl.reciprocal(jnp.sum(p_f, axis=-1, keepdims=True)
                            + jnp.sum(p_x, axis=-1, keepdims=True), approx=True)
        av = (jnp.dot(p_f.astype(cdt), v_f[:, sl], preferred_element_type=f32)
              + jnp.dot(p_x.astype(cdt), v_x[:, sl], preferred_element_type=f32))
        av = (av * inv).astype(cdt)                                             # (L, hd)
        attn = attn + jnp.dot(av, wo[sl, :], preferred_element_type=f32)
    attn = attn + bo

    # ---- residual + post-attention LayerNorm (f32) ----
    x1 = _layernorm(x_b.astype(f32) + attn,
                    g_attn_ref[0].astype(f32), b_attn_ref[0].astype(f32))

    # ---- FFW: Linear(d, 4d) -> GELU (tanh approx, EUP) -> Linear(4d, d) ----
    h1 = jnp.dot(x1.astype(cdt), w1_ref[0], preferred_element_type=f32) + b1_ref[0].astype(f32)
    c = math.sqrt(2.0 / math.pi)
    h1 = 0.5 * h1 * (1.0 + jnp.tanh(c * (h1 + 0.044715 * (h1 * h1 * h1))))
    h2 = jnp.dot(h1.astype(cdt), w2_ref[0], preferred_element_type=f32) + b2_ref[0].astype(f32)

    # ---- residual + post-FFW LayerNorm ----
    x2 = _layernorm(x1 + h2, g_ffw_ref[0].astype(f32), b_ffw_ref[0].astype(f32))

    out = x2.astype(cdt)
    carry_ref[...] = out                       # carried to the next layer in VMEM

    @pl.when(layer == pl.num_programs(1) - 1)
    def _():
        o_ref[0] = out                         # write output only on the last layer


def perceiver_resampler(patch_embeds, latents, stacked_params, num_heads):
    """patch_embeds: (B, S, d); latents: (num_latents, d);
    stacked_params: 16 arrays, each with a leading num_layers dim."""
    B, S, d = patch_embeds.shape
    L = latents.shape[0]
    num_layers = stacked_params[0].shape[0]
    latents = latents.astype(patch_embeds.dtype)

    lat_spec = pl.BlockSpec((L, d), lambda b, l: (0, 0))            # un-broadcast, resident
    xf_spec = pl.BlockSpec((1, S, d), lambda b, l: (b, 0, 0))
    # One layer-slice of each stacked weight per grid step along the layer axis.
    # TODO(synk): for production d_model, tile w1/w2 over the 4*d axis (extra grid
    # dim) / pl.Buffered(1) on weights so the resident set fits v7x's 64 MiB VMEM.
    param_specs = [
        pl.BlockSpec((1,) + p.shape[1:], lambda b, l: (l, 0, 0))
        for p in stacked_params
    ]
    out_spec = pl.BlockSpec((1, L, d), lambda b, l: (b, 0, 0))

    grid_spec = pltpu.PrefetchScalarGridSpec(
        num_scalar_prefetch=0,
        grid=(B, num_layers),                  # carried (layer) axis last
        in_specs=[lat_spec, xf_spec] + param_specs,
        out_specs=out_spec,
        scratch_shapes=[pltpu.VMEM((L, d), patch_embeds.dtype)],
    )
    # TODO(synk): on v7x with tiny B, add a second 'parallel' axis (e.g. tile L)
    # so both TensorCores get work.
    return pl.pallas_call(
        functools.partial(fused_resampler_kernel, num_heads=num_heads),
        grid_spec=grid_spec,
        out_shape=jax.ShapeDtypeStruct((B, L, d), patch_embeds.dtype),
        compiler_params=pltpu.CompilerParams(
            dimension_semantics=("parallel", "arbitrary")),
    )(latents, patch_embeds, *stacked_params)


# ---------------- pure-JAX reference (f32 math, exact-erf GELU) ----------------
def _ref_layer(x, x_f, params, num_heads):
    (wq, wk, wv, bq, bk, bv, wo, bo, g1, be1, w1, b1, w2, b2, g2, be2) = params
    f32 = jnp.float32
    x = x.astype(f32)
    kv = jnp.concatenate([x_f.astype(f32), x], axis=1)
    q = x @ wq.astype(f32) + bq.astype(f32)
    k = kv @ wk.astype(f32) + bk.astype(f32)
    v = kv @ wv.astype(f32) + bv.astype(f32)
    B, L, d = q.shape
    T = k.shape[1]
    hd = d // num_heads
    q = q.reshape(B, L, num_heads, hd).transpose(0, 2, 1, 3)
    k = k.reshape(B, T, num_heads, hd).transpose(0, 2, 1, 3)
    v = v.reshape(B, T, num_heads, hd).transpose(0, 2, 1, 3)
    s = jnp.einsum("bhld,bhtd->bhlt", q, k) / math.sqrt(hd)
    p = jax.nn.softmax(s, axis=-1)
    a = jnp.einsum("bhlt,bhtd->bhld", p, v).transpose(0, 2, 1, 3).reshape(B, L, d)
    a = a @ wo.astype(f32) + bo.astype(f32)
    x = _layernorm(x + a, g1.astype(f32), be1.astype(f32))
    h = x @ w1.astype(f32) + b1.astype(f32)
    h = 0.5 * h * (1.0 + jax.lax.erf(h / math.sqrt(2.0)))
    h = h @ w2.astype(f32) + b2.astype(f32)
    x = _layernorm(x + h, g2.astype(f32), be2.astype(f32))
    return x


def _ref_forward(patch_embeds, latents, layer_params, num_heads):
    B = patch_embeds.shape[0]
    lat = jnp.broadcast_to(latents[None], (B,) + latents.shape).astype(patch_embeds.dtype)
    for params in layer_params:
        lat = _ref_layer(lat, patch_embeds, params, num_heads).astype(patch_embeds.dtype)
    return lat


# ---------------- deterministic parameter construction ----------------
def make_layer_params(key, d_model, dtype):
    ks = jax.random.split(key, 8)
    scale = 1.0 / math.sqrt(d_model)
    wq = jax.random.normal(ks[0], (d_model, d_model), dtype) * scale
    wk = jax.random.normal(ks[1], (d_model, d_model), dtype) * scale
    wv = jax.random.normal(ks[2], (d_model, d_model), dtype) * scale
    wo = jax.random.normal(ks[3], (d_model, d_model), dtype) * scale
    bq = jax.random.normal(ks[4], (1, d_model), dtype) * 0.01
    bk = jnp.zeros((1, d_model), dtype)
    bv = jax.random.normal(ks[5], (1, d_model), dtype) * 0.01
    bo = jnp.zeros((1, d_model), dtype)
    g1 = jnp.ones((1, d_model), dtype)
    be1 = jnp.zeros((1, d_model), dtype)
    w1 = jax.random.normal(ks[6], (d_model, 4 * d_model), dtype) * scale
    b1 = jnp.zeros((1, 4 * d_model), dtype)
    w2 = jax.random.normal(ks[7], (4 * d_model, d_model), dtype) * (1.0 / math.sqrt(4 * d_model))
    b2 = jnp.zeros((1, d_model), dtype)
    g2 = jnp.ones((1, d_model), dtype)
    be2 = jnp.zeros((1, d_model), dtype)
    return (wq, wk, wv, bq, bk, bv, wo, bo, g1, be1, w1, b1, w2, b2, g2, be2)


if __name__ == "__main__":
    # small shapes consistent with the module's forward
    B, S, d_model = 2, 8, 32
    num_latents, num_layers, num_heads = 16, 2, 4
    dtype = jnp.bfloat16  # stand-in for torch.float16 on TPU

    key = jax.random.PRNGKey(0)
    k_lat, k_inp, k_layers = jax.random.split(key, 3)
    latents = jax.random.normal(k_lat, (num_latents, d_model), dtype)
    patch_embeds = jax.random.normal(k_inp, (B, S, d_model), dtype)
    layer_keys = jax.random.split(k_layers, num_layers)
    layer_params = [make_layer_params(k, d_model, dtype) for k in layer_keys]
    # stack per-layer weights with a leading layer dim for the fused kernel
    stacked_params = tuple(
        jnp.stack([lp[i] for lp in layer_params], axis=0)
        for i in range(len(layer_params[0]))
    )

    out = perceiver_resampler(patch_embeds, latents, stacked_params, num_heads)
    out = jax.block_until_ready(out)
    assert out.shape == (B, num_latents, d_model), out.shape

    ref = jax.block_until_ready(_ref_forward(patch_embeds, latents, layer_params, num_heads))
    err = jnp.max(jnp.abs(out.astype(jnp.float32) - ref.astype(jnp.float32)))
    # bf16 MXU inputs + tanh-GELU + approximate softmax reciprocal vs the exact
    # f32 / erf reference -> slightly looser tolerance than pure-f32 math.
    assert float(err) < 1e-1, f"mismatch vs reference: {err}"

    print("KERNEL_OK")
</pallas_src>

<mosaic_0001>
module attributes {stable_mosaic.version = 11 : i64} {
  func.func @fused_resampler_kernel(%arg0: i32, %arg1: i32, %arg2: memref<16x32xbf16, #tpu.memory_space<vmem>>, %arg3: memref<1x8x32xbf16, #tpu.memory_space<vmem>>, %arg4: memref<1x32x32xbf16, #tpu.memory_space<vmem>>, %arg5: memref<1x32x32xbf16, #tpu.memory_space<vmem>>, %arg6: memref<1x32x32xbf16, #tpu.memory_space<vmem>>, %arg7: memref<1x1x32xbf16, #tpu.memory_space<vmem>>, %arg8: memref<1x1x32xbf16, #tpu.memory_space<vmem>>, %arg9: memref<1x1x32xbf16, #tpu.memory_space<vmem>>, %arg10: memref<1x32x32xbf16, #tpu.memory_space<vmem>>, %arg11: memref<1x1x32xbf16, #tpu.memory_space<vmem>>, %arg12: memref<1x1x32xbf16, #tpu.memory_space<vmem>>, %arg13: memref<1x1x32xbf16, #tpu.memory_space<vmem>>, %arg14: memref<1x32x128xbf16, #tpu.memory_space<vmem>>, %arg15: memref<1x1x128xbf16, #tpu.memory_space<vmem>>, %arg16: memref<1x128x32xbf16, #tpu.memory_space<vmem>>, %arg17: memref<1x1x32xbf16, #tpu.memory_space<vmem>>, %arg18: memref<1x1x32xbf16, #tpu.memory_space<vmem>>, %arg19: memref<1x1x32xbf16, #tpu.memory_space<vmem>>, %arg20: memref<1x16x32xbf16, #tpu.memory_space<vmem>>, %arg21: memref<16x32xbf16, #tpu.memory_space<vmem>>) attributes {dimension_semantics = [#tpu.dimension_semantics<parallel>, #tpu.dimension_semantics<arbitrary>], iteration_bounds = array<i64: 2, 2>, scalar_prefetch = 0 : i64, scratch_operands = 1 : i64, tpu.core_type = #tpu.core_type<tc>, window_params = [{pipeline_mode = #tpu.pipeline_mode<synchronous>, transform_indices = @transform_0, window_bounds = array<i64: 16, 32>}, {transform_indices = @transform_1, window_bounds = array<i64: 1, 8, 32>}, {transform_indices = @transform_2, window_bounds = array<i64: 1, 32, 32>}, {transform_indices = @transform_3, window_bounds = array<i64: 1, 32, 32>}, {transform_indices = @transform_4, window_bounds = array<i64: 1, 32, 32>}, {transform_indices = @transform_5, window_bounds = array<i64: 1, 1, 32>}, {transform_indices = @transform_6, window_bounds = array<i64: 1, 1, 32>}, {transform_indices = @transform_7, window_bounds = array<i64: 1, 1, 32>}, {transform_indices = @transform_8, window_bounds = array<i64: 1, 32, 32>}, {transform_indices = @transform_9, window_bounds = array<i64: 1, 1, 32>}, {transform_indices = @transform_10, window_bounds = array<i64: 1, 1, 32>}, {transform_indices = @transform_11, window_bounds = array<i64: 1, 1, 32>}, {transform_indices = @transform_12, window_bounds = array<i64: 1, 32, 128>}, {transform_indices = @transform_13, window_bounds = array<i64: 1, 1, 128>}, {transform_indices = @transform_14, window_bounds = array<i64: 1, 128, 32>}, {transform_indices = @transform_15, window_bounds = array<i64: 1, 1, 32>}, {transform_indices = @transform_16, window_bounds = array<i64: 1, 1, 32>}, {transform_indices = @transform_17, window_bounds = array<i64: 1, 1, 32>}, {transform_indices = @transform_18, window_bounds = array<i64: 1, 16, 32>}]} {
    %c0_i32 = arith.constant 0 : i32
    %0 = arith.cmpi eq, %arg1, %c0_i32 : i32
    %1 = arith.extui %0 : i1 to i32
    %c0_i32_0 = arith.constant 0 : i32
    %2 = arith.cmpi ne, %1, %c0_i32_0 : i32
    scf.if %2 {
      %c0_114 = arith.constant 0 : index
      %c0_115 = arith.constant 0 : index
      %286 = vector.load %arg2[%c0_114, %c0_115] : memref<16x32xbf16, #tpu.memory_space<vmem>>, vector<16x32xbf16>
      %c0_116 = arith.constant 0 : index
      %c0_117 = arith.constant 0 : index
      %287 = vector.load %arg21[%c0_116, %c0_117] : memref<16x32xbf16, #tpu.memory_space<vmem>>, vector<16x32xbf16>
      tpu.vector_store %arg21[%c0_116, %c0_117], %286 {strides = array<i32>} : memref<16x32xbf16, #tpu.memory_space<vmem>>, vector<16x32xbf16>,
    } else {
    }
    %c0 = arith.constant 0 : index
    %c0_1 = arith.constant 0 : index
    %3 = vector.load %arg21[%c0, %c0_1] : memref<16x32xbf16, #tpu.memory_space<vmem>>, vector<16x32xbf16>
    %c0_2 = arith.constant 0 : index
    %c0_3 = arith.constant 0 : index
    %c0_4 = arith.constant 0 : index
    %4 = vector.load %arg3[%c0_2, %c0_3, %c0_4] : memref<1x8x32xbf16, #tpu.memory_space<vmem>>, vector<1x8x32xbf16>
    %5 = vector.shape_cast %4 : vector<1x8x32xbf16> to vector<8x32xbf16>
    %c0_5 = arith.constant 0 : index
    %c0_6 = arith.constant 0 : index
    %c0_7 = arith.constant 0 : index
    %6 = vector.load %arg4[%c0_5, %c0_6, %c0_7] : memref<1x32x32xbf16, #tpu.memory_space<vmem>>, vector<1x32x32xbf16>
    %7 = vector.shape_cast %6 : vector<1x32x32xbf16> to vector<32x32xbf16>
    %c0_8 = arith.constant 0 : index
    %c0_9 = arith.constant 0 : index
    %c0_10 = arith.constant 0 : index
    %8 = vector.load %arg5[%c0_8, %c0_9, %c0_10] : memref<1x32x32xbf16, #tpu.memory_space<vmem>>, vector<1x32x32xbf16>
    %9 = vector.shape_cast %8 : vector<1x32x32xbf16> to vector<32x32xbf16>
    %c0_11 = arith.constant 0 : index
    %c0_12 = arith.constant 0 : index
    %c0_13 = arith.constant 0 : index
    %10 = vector.load %arg6[%c0_11, %c0_12, %c0_13] : memref<1x32x32xbf16, #tpu.memory_space<vmem>>, vector<1x32x32xbf16>
    %11 = vector.shape_cast %10 : vector<1x32x32xbf16> to vector<32x32xbf16>
    %c0_14 = arith.constant 0 : index
    %c0_15 = arith.constant 0 : index
    %c0_16 = arith.constant 0 : index
    %12 = vector.load %arg10[%c0_14, %c0_15, %c0_16] : memref<1x32x32xbf16, #tpu.memory_space<vmem>>, vector<1x32x32xbf16>
    %13 = vector.shape_cast %12 : vector<1x32x32xbf16> to vector<32x32xbf16>
    %c0_17 = arith.constant 0 : index
    %c0_18 = arith.constant 0 : index
    %c0_19 = arith.constant 0 : index
    %14 = vector.load %arg7[%c0_17, %c0_18, %c0_19] : memref<1x1x32xbf16, #tpu.memory_space<vmem>>, vector<1x1x32xbf16>
    %15 = vector.shape_cast %14 : vector<1x1x32xbf16> to vector<1x32xbf16>
    %16 = arith.extf %15 : vector<1x32xbf16> to vector<1x32xf32>
    %c0_20 = arith.constant 0 : index
    %c0_21 = arith.constant 0 : index
    %c0_22 = arith.constant 0 : index
    %17 = vector.load %arg8[%c0_20, %c0_21, %c0_22] : memref<1x1x32xbf16, #tpu.memory_space<vmem>>, vector<1x1x32xbf16>
    %18 = vector.shape_cast %17 : vector<1x1x32xbf16> to vector<1x32xbf16>
    %19 = arith.extf %18 : vector<1x32xbf16> to vector<1x32xf32>
    %c0_23 = arith.constant 0 : index
    %c0_24 = arith.constant 0 : index
    %c0_25 = arith.constant 0 : index
    %20 = vector.load %arg9[%c0_23, %c0_24, %c0_25] : memref<1x1x32xbf16, #tpu.memory_space<vmem>>, vector<1x1x32xbf16>
    %21 = vector.shape_cast %20 : vector<1x1x32xbf16> to vector<1x32xbf16>
    %22 = arith.extf %21 : vector<1x32xbf16> to vector<1x32xf32>
    %c0_26 = arith.constant 0 : index
    %c0_27 = arith.constant 0 : index
    %c0_28 = arith.constant 0 : index
    %23 = vector.load %arg11[%c0_26, %c0_27, %c0_28] : memref<1x1x32xbf16, #tpu.memory_space<vmem>>, vector<1x1x32xbf16>
    %24 = vector.shape_cast %23 : vector<1x1x32xbf16> to vector<1x32xbf16>
    %25 = arith.extf %24 : vector<1x32xbf16> to vector<1x32xf32>
    %cst = arith.constant dense<0.000000e+00> : vector<16x32xf32>
    %26 = tpu.matmul %3, %7, %cst {dimension_numbers = #tpu.dot_dimension_numbers<[1], [0], [0], [1], [0, 0, 1, 1], [], []>} : vector<16x32xbf16>, vector<32x32xbf16>, vector<16x32xf32> -> vector<16x32xf32>
    %27 = vector.broadcast %16 : vector<1x32xf32> to vector<16x32xf32>
    %28 = arith.addf %26, %27 : vector<16x32xf32>
    %cst_29 = arith.constant 0.353553385 : f32
    %29 = vector.broadcast %cst_29 : f32 to vector<16x32xf32>
    %30 = arith.mulf %28, %29 : vector<16x32xf32>
    %31 = arith.truncf %30 : vector<16x32xf32> to vector<16x32xbf16>
    %cst_30 = arith.constant dense<0.000000e+00> : vector<8x32xf32>
    %32 = tpu.matmul %5, %9, %cst_30 {dimension_numbers = #tpu.dot_dimension_numbers<[1], [0], [0], [1], [0, 0, 1, 1], [], []>} : vector<8x32xbf16>, vector<32x32xbf16>, vector<8x32xf32> -> vector<8x32xf32>
    %33 = vector.broadcast %19 : vector<1x32xf32> to vector<8x32xf32>
    %34 = arith.addf %32, %33 : vector<8x32xf32>
    %35 = arith.truncf %34 : vector<8x32xf32> to vector<8x32xbf16>
    %cst_31 = arith.constant dense<0.000000e+00> : vector<16x32xf32>
    %36 = tpu.matmul %3, %9, %cst_31 {dimension_numbers = #tpu.dot_dimension_numbers<[1], [0], [0], [1], [0, 0, 1, 1], [], []>} : vector<16x32xbf16>, vector<32x32xbf16>, vector<16x32xf32> -> vector<16x32xf32>
    %37 = vector.broadcast %19 : vector<1x32xf32> to vector<16x32xf32>
    %38 = arith.addf %36, %37 : vector<16x32xf32>
    %39 = arith.truncf %38 : vector<16x32xf32> to vector<16x32xbf16>
    %cst_32 = arith.constant dense<0.000000e+00> : vector<8x32xf32>
    %40 = tpu.matmul %5, %11, %cst_32 {dimension_numbers = #tpu.dot_dimension_numbers<[1], [0], [0], [1], [0, 0, 1, 1], [], []>} : vector<8x32xbf16>, vector<32x32xbf16>, vector<8x32xf32> -> vector<8x32xf32>
    %41 = vector.broadcast %22 : vector<1x32xf32> to vector<8x32xf32>
    %42 = arith.addf %40, %41 : vector<8x32xf32>
    %43 = arith.truncf %42 : vector<8x32xf32> to vector<8x32xbf16>
    %cst_33 = arith.constant dense<0.000000e+00> : vector<16x32xf32>
    %44 = tpu.matmul %3, %11, %cst_33 {dimension_numbers = #tpu.dot_dimension_numbers<[1], [0], [0], [1], [0, 0, 1, 1], [], []>} : vector<16x32xbf16>, vector<32x32xbf16>, vector<16x32xf32> -> vector<16x32xf32>
    %45 = vector.broadcast %22 : vector<1x32xf32> to vector<16x32xf32>
    %46 = arith.addf %44, %45 : vector<16x32xf32>
    %47 = arith.truncf %46 : vector<16x32xf32> to vector<16x32xbf16>
    %cst_34 = arith.constant 0.000000e+00 : f32
    %48 = vector.broadcast %cst_34 : f32 to vector<16x32xf32>
    %49 = vector.extract_strided_slice %31 {offsets = [0, 0], sizes = [16, 8], strides = [1, 1]} : vector<16x32xbf16> to vector<16x8xbf16>
    %50 = vector.extract_strided_slice %35 {offsets = [0, 0], sizes = [8, 8], strides = [1, 1]} : vector<8x32xbf16> to vector<8x8xbf16>
    "tpu.trace_start"() <{level = 10 : i32, message = "ld,td->lt"}> : () -> ()
    %cst_35 = arith.constant dense<0.000000e+00> : vector<16x8xf32>
    %51 = tpu.matmul %49, %50, %cst_35 {dimension_numbers = #tpu.dot_dimension_numbers<[1], [1], [0], [0], [0, 0, 1, 0], [], []>} : vector<16x8xbf16>, vector<8x8xbf16>, vector<16x8xf32> -> vector<16x8xf32>
    "tpu.trace_stop"() : () -> ()
    %52 = vector.extract_strided_slice %39 {offsets = [0, 0], sizes = [16, 8], strides = [1, 1]} : vector<16x32xbf16> to vector<16x8xbf16>
    "tpu.trace_start"() <{level = 10 : i32, message = "ld,td->lt"}> : () -> ()
    %cst_36 = arith.constant dense<0.000000e+00> : vector<16x16xf32>
    %53 = tpu.matmul %49, %52, %cst_36 {dimension_numbers = #tpu.dot_dimension_numbers<[1], [1], [0], [0], [0, 0, 1, 0], [], []>} : vector<16x8xbf16>, vector<16x8xbf16>, vector<16x16xf32> -> vector<16x16xf32>
    "tpu.trace_stop"() : () -> ()
    %cst_37 = arith.constant dense<0xFF800000> : vector<16xf32>
    %54 = vector.multi_reduction <maximumf>, %51, %cst_37 [1] : vector<16x8xf32> to vector<16xf32>
    %55 = vector.shape_cast %54 : vector<16xf32> to vector<16x1xf32>
    %cst_38 = arith.constant dense<0xFF800000> : vector<16xf32>
    %56 = vector.multi_reduction <maximumf>, %53, %cst_38 [1] : vector<16x16xf32> to vector<16xf32>
    %57 = vector.shape_cast %56 : vector<16xf32> to vector<16x1xf32>
    %58 = arith.maximumf %55, %57 : vector<16x1xf32>
    %59 = vector.broadcast %58 : vector<16x1xf32> to vector<16x8xf32>
    %60 = arith.subf %51, %59 : vector<16x8xf32>
    %61 = math.exp %60 : vector<16x8xf32>
    %62 = vector.broadcast %58 : vector<16x1xf32> to vector<16x16xf32>
    %63 = arith.subf %53, %62 : vector<16x16xf32>
    %64 = math.exp %63 : vector<16x16xf32>
    %cst_39 = arith.constant dense<0.000000e+00> : vector<16xf32>
    %65 = vector.multi_reduction <add>, %61, %cst_39 [1] : vector<16x8xf32> to vector<16xf32>
    %66 = vector.shape_cast %65 : vector<16xf32> to vector<16x1xf32>
    %cst_40 = arith.constant dense<0.000000e+00> : vector<16xf32>
    %67 = vector.multi_reduction <add>, %64, %cst_40 [1] : vector<16x16xf32> to vector<16xf32>
    %68 = vector.shape_cast %67 : vector<16xf32> to vector<16x1xf32>
    %69 = arith.addf %66, %68 : vector<16x1xf32>
    %70 = tpu.reciprocal %69 {approx = true} : vector<16x1xf32> -> vector<16x1xf32>
    %71 = arith.truncf %61 : vector<16x8xf32> to vector<16x8xbf16>
    %72 = vector.extract_strided_slice %43 {offsets = [0, 0], sizes = [8, 8], strides = [1, 1]} : vector<8x32xbf16> to vector<8x8xbf16>
    %cst_41 = arith.constant dense<0.000000e+00> : vector<16x8xf32>
    %73 = tpu.matmul %71, %72, %cst_41 {dimension_numbers = #tpu.dot_dimension_numbers<[1], [0], [0], [1], [0, 0, 1, 1], [], []>} : vector<16x8xbf16>, vector<8x8xbf16>, vector<16x8xf32> -> vector<16x8xf32>
    %74 = arith.truncf %64 : vector<16x16xf32> to vector<16x16xbf16>
    %75 = vector.extract_strided_slice %47 {offsets = [0, 0], sizes = [16, 8], strides = [1, 1]} : vector<16x32xbf16> to vector<16x8xbf16>
    %cst_42 = arith.constant dense<0.000000e+00> : vector<16x8xf32>
    %76 = tpu.matmul %74, %75, %cst_42 {dimension_numbers = #tpu.dot_dimension_numbers<[1], [0], [0], [1], [0, 0, 1, 1], [], []>} : vector<16x16xbf16>, vector<16x8xbf16>, vector<16x8xf32> -> vector<16x8xf32>
    %77 = arith.addf %73, %76 : vector<16x8xf32>
    %78 = vector.broadcast %70 : vector<16x1xf32> to vector<16x8xf32>
    %79 = arith.mulf %77, %78 : vector<16x8xf32>
    %80 = arith.truncf %79 : vector<16x8xf32> to vector<16x8xbf16>
    %81 = vector.extract_strided_slice %13 {offsets = [0, 0], sizes = [8, 32], strides = [1, 1]} : vector<32x32xbf16> to vector<8x32xbf16>
    %cst_43 = arith.constant dense<0.000000e+00> : vector<16x32xf32>
    %82 = tpu.matmul %80, %81, %cst_43 {dimension_numbers = #tpu.dot_dimension_numbers<[1], [0], [0], [1], [0, 0, 1, 1], [], []>} : vector<16x8xbf16>, vector<8x32xbf16>, vector<16x32xf32> -> vector<16x32xf32>
    %83 = arith.addf %48, %82 : vector<16x32xf32>
    %84 = vector.extract_strided_slice %31 {offsets = [0, 8], sizes = [16, 8], strides = [1, 1]} : vector<16x32xbf16> to vector<16x8xbf16>
    %85 = vector.extract_strided_slice %35 {offsets = [0, 8], sizes = [8, 8], strides = [1, 1]} : vector<8x32xbf16> to vector<8x8xbf16>
    "tpu.trace_start"() <{level = 10 : i32, message = "ld,td->lt"}> : () -> ()
    %cst_44 = arith.constant dense<0.000000e+00> : vector<16x8xf32>
    %86 = tpu.matmul %84, %85, %cst_44 {dimension_numbers = #tpu.dot_dimension_numbers<[1], [1], [0], [0], [0, 0, 1, 0], [], []>} : vector<16x8xbf16>, vector<8x8xbf16>, vector<16x8xf32> -> vector<16x8xf32>
    "tpu.trace_stop"() : () -> ()
    %87 = vector.extract_strided_slice %39 {offsets = [0, 8], sizes = [16, 8], strides = [1, 1]} : vector<16x32xbf16> to vector<16x8xbf16>
    "tpu.trace_start"() <{level = 10 : i32, message = "ld,td->lt"}> : () -> ()
    %cst_45 = arith.constant dense<0.000000e+00> : vector<16x16xf32>
    %88 = tpu.matmul %84, %87, %cst_45 {dimension_numbers = #tpu.dot_dimension_numbers<[1], [1], [0], [0], [0, 0, 1, 0], [], []>} : vector<16x8xbf16>, vector<16x8xbf16>, vector<16x16xf32> -> vector<16x16xf32>
    "tpu.trace_stop"() : () -> ()
    %cst_46 = arith.constant dense<0xFF800000> : vector<16xf32>
    %89 = vector.multi_reduction <maximumf>, %86, %cst_46 [1] : vector<16x8xf32> to vector<16xf32>
    %90 = vector.shape_cast %89 : vector<16xf32> to vector<16x1xf32>
    %cst_47 = arith.constant dense<0xFF800000> : vector<16xf32>
    %91 = vector.multi_reduction <maximumf>, %88, %cst_47 [1] : vector<16x16xf32> to vector<16xf32>
    %92 = vector.shape_cast %91 : vector<16xf32> to vector<16x1xf32>
    %93 = arith.maximumf %90, %92 : vector<16x1xf32>
    %94 = vector.broadcast %93 : vector<16x1xf32> to vector<16x8xf32>
    %95 = arith.subf %86, %94 : vector<16x8xf32>
    %96 = math.exp %95 : vector<16x8xf32>
    %97 = vector.broadcast %93 : vector<16x1xf32> to vector<16x16xf32>
    %98 = arith.subf %88, %97 : vector<16x16xf32>
    %99 = math.exp %98 : vector<16x16xf32>
    %cst_48 = arith.constant dense<0.000000e+00> : vector<16xf32>
    %100 = vector.multi_reduction <add>, %96, %cst_48 [1] : vector<16x8xf32> to vector<16xf32>
    %101 = vector.shape_cast %100 : vector<16xf32> to vector<16x1xf32>
    %cst_49 = arith.constant dense<0.000000e+00> : vector<16xf32>
    %102 = vector.multi_reduction <add>, %99, %cst_49 [1] : vector<16x16xf32> to vector<16xf32>
    %103 = vector.shape_cast %102 : vector<16xf32> to vector<16x1xf32>
    %104 = arith.addf %101, %103 : vector<16x1xf32>
    %105 = tpu.reciprocal %104 {approx = true} : vector<16x1xf32> -> vector<16x1xf32>
    %106 = arith.truncf %96 : vector<16x8xf32> to vector<16x8xbf16>
    %107 = vector.extract_strided_slice %43 {offsets = [0, 8], sizes = [8, 8], strides = [1, 1]} : vector<8x32xbf16> to vector<8x8xbf16>
    %cst_50 = arith.constant dense<0.000000e+00> : vector<16x8xf32>
    %108 = tpu.matmul %106, %107, %cst_50 {dimension_numbers = #tpu.dot_dimension_numbers<[1], [0], [0], [1], [0, 0, 1, 1], [], []>} : vector<16x8xbf16>, vector<8x8xbf16>, vector<16x8xf32> -> vector<16x8xf32>
    %109 = arith.truncf %99 : vector<16x16xf32> to vector<16x16xbf16>
    %110 = vector.extract_strided_slice %47 {offsets = [0, 8], sizes = [16, 8], strides = [1, 1]} : vector<16x32xbf16> to vector<16x8xbf16>
    %cst_51 = arith.constant dense<0.000000e+00> : vector<16x8xf32>
    %111 = tpu.matmul %109, %110, %cst_51 {dimension_numbers = #tpu.dot_dimension_numbers<[1], [0], [0], [1], [0, 0, 1, 1], [], []>} : vector<16x16xbf16>, vector<16x8xbf16>, vector<16x8xf32> -> vector<16x8xf32>
    %112 = arith.addf %108, %111 : vector<16x8xf32>
    %113 = vector.broadcast %105 : vector<16x1xf32> to vector<16x8xf32>
    %114 = arith.mulf %112, %113 : vector<16x8xf32>
    %115 = arith.truncf %114 : vector<16x8xf32> to vector<16x8xbf16>
    %116 = vector.extract_strided_slice %13 {offsets = [8, 0], sizes = [8, 32], strides = [1, 1]} : vector<32x32xbf16> to vector<8x32xbf16>
    %cst_52 = arith.constant dense<0.000000e+00> : vector<16x32xf32>
    %117 = tpu.matmul %115, %116, %cst_52 {dimension_numbers = #tpu.dot_dimension_numbers<[1], [0], [0], [1], [0, 0, 1, 1], [], []>} : vector<16x8xbf16>, vector<8x32xbf16>, vector<16x32xf32> -> vector<16x32xf32>
    %118 = arith.addf %83, %117 : vector<16x32xf32>
    %119 = vector.extract_strided_slice %31 {offsets = [0, 16], sizes = [16, 8], strides = [1, 1]} : vector<16x32xbf16> to vector<16x8xbf16>
    %120 = vector.extract_strided_slice %35 {offsets = [0, 16], sizes = [8, 8], strides = [1, 1]} : vector<8x32xbf16> to vector<8x8xbf16>
    "tpu.trace_start"() <{level = 10 : i32, message = "ld,td->lt"}> : () -> ()
    %cst_53 = arith.constant dense<0.000000e+00> : vector<16x8xf32>
    %121 = tpu.matmul %119, %120, %cst_53 {dimension_numbers = #tpu.dot_dimension_numbers<[1], [1], [0], [0], [0, 0, 1, 0], [], []>} : vector<16x8xbf16>, vector<8x8xbf16>, vector<16x8xf32> -> vector<16x8xf32>
    "tpu.trace_stop"() : () -> ()
    %122 = vector.extract_strided_slice %39 {offsets = [0, 16], sizes = [16, 8], strides = [1, 1]} : vector<16x32xbf16> to vector<16x8xbf16>
    "tpu.trace_start"() <{level = 10 : i32, message = "ld,td->lt"}> : () -> ()
    %cst_54 = arith.constant dense<0.000000e+00> : vector<16x16xf32>
    %123 = tpu.matmul %119, %122, %cst_54 {dimension_numbers = #tpu.dot_dimension_numbers<[1], [1], [0], [0], [0, 0, 1, 0], [], []>} : vector<16x8xbf16>, vector<16x8xbf16>, vector<16x16xf32> -> vector<16x16xf32>
    "tpu.trace_stop"() : () -> ()
    %cst_55 = arith.constant dense<0xFF800000> : vector<16xf32>
    %124 = vector.multi_reduction <maximumf>, %121, %cst_55 [1] : vector<16x8xf32> to vector<16xf32>
    %125 = vector.shape_cast %124 : vector<16xf32> to vector<16x1xf32>
    %cst_56 = arith.constant dense<0xFF800000> : vector<16xf32>
    %126 = vector.multi_reduction <maximumf>, %123, %cst_56 [1] : vector<16x16xf32> to vector<16xf32>
    %127 = vector.shape_cast %126 : vector<16xf32> to vector<16x1xf32>
    %128 = arith.maximumf %125, %127 : vector<16x1xf32>
    %129 = vector.broadcast %128 : vector<16x1xf32> to vector<16x8xf32>
    %130 = arith.subf %121, %129 : vector<16x8xf32>
    %131 = math.exp %130 : vector<16x8xf32>
    %132 = vector.broadcast %128 : vector<16x1xf32> to vector<16x16xf32>
    %133 = arith.subf %123, %132 : vector<16x16xf32>
    %134 = math.exp %133 : vector<16x16xf32>
    %cst_57 = arith.constant dense<0.000000e+00> : vector<16xf32>
    %135 = vector.multi_reduction <add>, %131, %cst_57 [1] : vector<16x8xf32> to vector<16xf32>
    %136 = vector.shape_cast %135 : vector<16xf32> to vector<16x1xf32>
    %cst_58 = arith.constant dense<0.000000e+00> : vector<16xf32>
    %137 = vector.multi_reduction <add>, %134, %cst_58 [1] : vector<16x16xf32> to vector<16xf32>
    %138 = vector.shape_cast %137 : vector<16xf32> to vector<16x1xf32>
    %139 = arith.addf %136, %138 : vector<16x1xf32>
    %140 = tpu.reciprocal %139 {approx = true} : vector<16x1xf32> -> vector<16x1xf32>
    %141 = arith.truncf %131 : vector<16x8xf32> to vector<16x8xbf16>
    %142 = vector.extract_strided_slice %43 {offsets = [0, 16], sizes = [8, 8], strides = [1, 1]} : vector<8x32xbf16> to vector<8x8xbf16>
    %cst_59 = arith.constant dense<0.000000e+00> : vector<16x8xf32>
    %143 = tpu.matmul %141, %142, %cst_59 {dimension_numbers = #tpu.dot_dimension_numbers<[1], [0], [0], [1], [0, 0, 1, 1], [], []>} : vector<16x8xbf16>, vector<8x8xbf16>, vector<16x8xf32> -> vector<16x8xf32>
    %144 = arith.truncf %134 : vector<16x16xf32> to vector<16x16xbf16>
    %145 = vector.extract_strided_slice %47 {offsets = [0, 16], sizes = [16, 8], strides = [1, 1]} : vector<16x32xbf16> to vector<16x8xbf16>
    %cst_60 = arith.constant dense<0.000000e+00> : vector<16x8xf32>
    %146 = tpu.matmul %144, %145, %cst_60 {dimension_numbers = #tpu.dot_dimension_numbers<[1], [0], [0], [1], [0, 0, 1, 1], [], []>} : vector<16x16xbf16>, vector<16x8xbf16>, vector<16x8xf32> -> vector<16x8xf32>
    %147 = arith.addf %143, %146 : vector<16x8xf32>
    %148 = vector.broadcast %140 : vector<16x1xf32> to vector<16x8xf32>
    %149 = arith.mulf %147, %148 : vector<16x8xf32>
    %150 = arith.truncf %149 : vector<16x8xf32> to vector<16x8xbf16>
    %151 = vector.extract_strided_slice %13 {offsets = [16, 0], sizes = [8, 32], strides = [1, 1]} : vector<32x32xbf16> to vector<8x32xbf16>
    %cst_61 = arith.constant dense<0.000000e+00> : vector<16x32xf32>
    %152 = tpu.matmul %150, %151, %cst_61 {dimension_numbers = #tpu.dot_dimension_numbers<[1], [0], [0], [1], [0, 0, 1, 1], [], []>} : vector<16x8xbf16>, vector<8x32xbf16>, vector<16x32xf32> -> vector<16x32xf32>
    %153 = arith.addf %118, %152 : vector<16x32xf32>
    %154 = vector.extract_strided_slice %31 {offsets = [0, 24], sizes = [16, 8], strides = [1, 1]} : vector<16x32xbf16> to vector<16x8xbf16>
    %155 = vector.extract_strided_slice %35 {offsets = [0, 24], sizes = [8, 8], strides = [1, 1]} : vector<8x32xbf16> to vector<8x8xbf16>
    "tpu.trace_start"() <{level = 10 : i32, message = "ld,td->lt"}> : () -> ()
    %cst_62 = arith.constant dense<0.000000e+00> : vector<16x8xf32>
    %156 = tpu.matmul %154, %155, %cst_62 {dimension_numbers = #tpu.dot_dimension_numbers<[1], [1], [0], [0], [0, 0, 1, 0], [], []>} : vector<16x8xbf16>, vector<8x8xbf16>, vector<16x8xf32> -> vector<16x8xf32>
    "tpu.trace_stop"() : () -> ()
    %157 = vector.extract_strided_slice %39 {offsets = [0, 24], sizes = [16, 8], strides = [1, 1]} : vector<16x32xbf16> to vector<16x8xbf16>
    "tpu.trace_start"() <{level = 10 : i32, message = "ld,td->lt"}> : () -> ()
    %cst_63 = arith.constant dense<0.000000e+00> : vector<16x16xf32>
    %158 = tpu.matmul %154, %157, %cst_63 {dimension_numbers = #tpu.dot_dimension_numbers<[1], [1], [0], [0], [0, 0, 1, 0], [], []>} : vector<16x8xbf16>, vector<16x8xbf16>, vector<16x16xf32> -> vector<16x16xf32>
    "tpu.trace_stop"() : () -> ()
    %cst_64 = arith.constant dense<0xFF800000> : vector<16xf32>
    %159 = vector.multi_reduction <maximumf>, %156, %cst_64 [1] : vector<16x8xf32> to vector<16xf32>
    %160 = vector.shape_cast %159 : vector<16xf32> to vector<16x1xf32>
    %cst_65 = arith.constant dense<0xFF800000> : vector<16xf32>
    %161 = vector.multi_reduction <maximumf>, %158, %cst_65 [1] : vector<16x16xf32> to vector<16xf32>
    %162 = vector.shape_cast %161 : vector<16xf32> to vector<16x1xf32>
    %163 = arith.maximumf %160, %162 : vector<16x1xf32>
    %164 = vector.broadcast %163 : vector<16x1xf32> to vector<16x8xf32>
    %165 = arith.subf %156, %164 : vector<16x8xf32>
    %166 = math.exp %165 : vector<16x8xf32>
    %167 = vector.broadcast %163 : vector<16x1xf32> to vector<16x16xf32>
    %168 = arith.subf %158, %167 : vector<16x16xf32>
    %169 = math.exp %168 : vector<16x16xf32>
    %cst_66 = arith.constant dense<0.000000e+00> : vector<16xf32>
    %170 = vector.multi_reduction <add>, %166, %cst_66 [1] : vector<16x8xf32> to vector<16xf32>
    %171 = vector.shape_cast %170 : vector<16xf32> to vector<16x1xf32>
    %cst_67 = arith.constant dense<0.000000e+00> : vector<16xf32>
    %172 = vector.multi_reduction <add>, %169, %cst_67 [1] : vector<16x16xf32> to vector<16xf32>
    %173 = vector.shape_cast %172 : vector<16xf32> to vector<16x1xf32>
    %174 = arith.addf %171, %173 : vector<16x1xf32>
    %175 = tpu.reciprocal %174 {approx = true} : vector<16x1xf32> -> vector<16x1xf32>
    %176 = arith.truncf %166 : vector<16x8xf32> to vector<16x8xbf16>
    %177 = vector.extract_strided_slice %43 {offsets = [0, 24], sizes = [8, 8], strides = [1, 1]} : vector<8x32xbf16> to vector<8x8xbf16>
    %cst_68 = arith.constant dense<0.000000e+00> : vector<16x8xf32>
    %178 = tpu.matmul %176, %177, %cst_68 {dimension_numbers = #tpu.dot_dimension_numbers<[1], [0], [0], [1], [0, 0, 1, 1], [], []>} : vector<16x8xbf16>, vector<8x8xbf16>, vector<16x8xf32> -> vector<16x8xf32>
    %179 = arith.truncf %169 : vector<16x16xf32> to vector<16x16xbf16>
    %180 = vector.extract_strided_slice %47 {offsets = [0, 24], sizes = [16, 8], strides = [1, 1]} : vector<16x32xbf16> to vector<16x8xbf16>
    %cst_69 = arith.constant dense<0.000000e+00> : vector<16x8xf32>
    %181 = tpu.matmul %179, %180, %cst_69 {dimension_numbers = #tpu.dot_dimension_numbers<[1], [0], [0], [1], [0, 0, 1, 1], [], []>} : vector<16x16xbf16>, vector<16x8xbf16>, vector<16x8xf32> -> vector<16x8xf32>
    %182 = arith.addf %178, %181 : vector<16x8xf32>
    %183 = vector.broadcast %175 : vector<16x1xf32> to vector<16x8xf32>
    %184 = arith.mulf %182, %183 : vector<16x8xf32>
    %185 = arith.truncf %184 : vector<16x8xf32> to vector<16x8xbf16>
    %186 = vector.extract_strided_slice %13 {offsets = [24, 0], sizes = [8, 32], strides = [1, 1]} : vector<32x32xbf16> to vector<8x32xbf16>
    %cst_70 = arith.constant dense<0.000000e+00> : vector<16x32xf32>
    %187 = tpu.matmul %185, %186, %cst_70 {dimension_numbers = #tpu.dot_dimension_numbers<[1], [0], [0], [1], [0, 0, 1, 1], [], []>} : vector<16x8xbf16>, vector<8x32xbf16>, vector<16x32xf32> -> vector<16x32xf32>
    %188 = arith.addf %153, %187 : vector<16x32xf32>
    %189 = vector.broadcast %25 : vector<1x32xf32> to vector<16x32xf32>
    %190 = arith.addf %188, %189 : vector<16x32xf32>
    %191 = arith.extf %3 : vector<16x32xbf16> to vector<16x32xf32>
    %192 = arith.addf %191, %190 : vector<16x32xf32>
    %c0_71 = arith.constant 0 : index
    %c0_72 = arith.constant 0 : index
    %c0_73 = arith.constant 0 : index
    %193 = vector.load %arg12[%c0_71, %c0_72, %c0_73] : memref<1x1x32xbf16, #tpu.memory_space<vmem>>, vector<1x1x32xbf16>
    %194 = vector.shape_cast %193 : vector<1x1x32xbf16> to vector<1x32xbf16>
    %195 = arith.extf %194 : vector<1x32xbf16> to vector<1x32xf32>
    %c0_74 = arith.constant 0 : index
    %c0_75 = arith.constant 0 : index
    %c0_76 = arith.constant 0 : index
    %196 = vector.load %arg13[%c0_74, %c0_75, %c0_76] : memref<1x1x32xbf16, #tpu.memory_space<vmem>>, vector<1x1x32xbf16>
    %197 = vector.shape_cast %196 : vector<1x1x32xbf16> to vector<1x32xbf16>
    %198 = arith.extf %197 : vector<1x32xbf16> to vector<1x32xf32>
    %cst_77 = arith.constant dense<0.000000e+00> : vector<16xf32>
    %199 = vector.multi_reduction <add>, %192, %cst_77 [1] : vector<16x32xf32> to vector<16xf32>
    %200 = vector.shape_cast %199 : vector<16xf32> to vector<16x1xf32>
    %cst_78 = arith.constant 3.200000e+01 : f32
    %201 = vector.broadcast %cst_78 : f32 to vector<16x1xf32>
    %202 = arith.divf %200, %201 : vector<16x1xf32>
    %203 = vector.broadcast %202 : vector<16x1xf32> to vector<16x32xf32>
    %204 = arith.subf %192, %203 : vector<16x32xf32>
    %205 = arith.mulf %204, %204 : vector<16x32xf32>
    %cst_79 = arith.constant dense<0.000000e+00> : vector<16xf32>
    %206 = vector.multi_reduction <add>, %205, %cst_79 [1] : vector<16x32xf32> to vector<16xf32>
    %207 = vector.shape_cast %206 : vector<16xf32> to vector<16x1xf32>
    %cst_80 = arith.constant 3.200000e+01 : f32
    %208 = vector.broadcast %cst_80 : f32 to vector<16x1xf32>
    %209 = arith.divf %207, %208 : vector<16x1xf32>
    %210 = vector.broadcast %202 : vector<16x1xf32> to vector<16x32xf32>
    %211 = arith.subf %192, %210 : vector<16x32xf32>
    %cst_81 = arith.constant 9.99999974E-6 : f32
    %212 = vector.broadcast %cst_81 : f32 to vector<16x1xf32>
    %213 = arith.addf %209, %212 : vector<16x1xf32>
    %214 = math.rsqrt %213 : vector<16x1xf32>
    %215 = vector.broadcast %214 : vector<16x1xf32> to vector<16x32xf32>
    %216 = arith.mulf %211, %215 : vector<16x32xf32>
    %217 = vector.broadcast %195 : vector<1x32xf32> to vector<16x32xf32>
    %218 = arith.mulf %216, %217 : vector<16x32xf32>
    %219 = vector.broadcast %198 : vector<1x32xf32> to vector<16x32xf32>
    %220 = arith.addf %218, %219 : vector<16x32xf32>
    %221 = arith.truncf %220 : vector<16x32xf32> to vector<16x32xbf16>
    %c0_82 = arith.constant 0 : index
    %c0_83 = arith.constant 0 : index
    %c0_84 = arith.constant 0 : index
    %222 = vector.load %arg14[%c0_82, %c0_83, %c0_84] : memref<1x32x128xbf16, #tpu.memory_space<vmem>>, vector<1x32x128xbf16>
    %223 = vector.shape_cast %222 : vector<1x32x128xbf16> to vector<32x128xbf16>
    %cst_85 = arith.constant dense<0.000000e+00> : vector<16x128xf32>
    %224 = tpu.matmul %221, %223, %cst_85 {dimension_numbers = #tpu.dot_dimension_numbers<[1], [0], [0], [1], [0, 0, 1, 1], [], []>} : vector<16x32xbf16>, vector<32x128xbf16>, vector<16x128xf32> -> vector<16x128xf32>
    %c0_86 = arith.constant 0 : index
    %c0_87 = arith.constant 0 : index
    %c0_88 = arith.constant 0 : index
    %225 = vector.load %arg15[%c0_86, %c0_87, %c0_88] : memref<1x1x128xbf16, #tpu.memory_space<vmem>>, vector<1x1x128xbf16>
    %226 = vector.shape_cast %225 : vector<1x1x128xbf16> to vector<1x128xbf16>
    %227 = arith.extf %226 : vector<1x128xbf16> to vector<1x128xf32>
    %228 = vector.broadcast %227 : vector<1x128xf32> to vector<16x128xf32>
    %229 = arith.addf %224, %228 : vector<16x128xf32>
    %cst_89 = arith.constant 5.000000e-01 : f32
    %230 = vector.broadcast %cst_89 : f32 to vector<16x128xf32>
    %231 = arith.mulf %230, %229 : vector<16x128xf32>
    %232 = arith.mulf %229, %229 : vector<16x128xf32>
    %233 = arith.mulf %232, %229 : vector<16x128xf32>
    %cst_90 = arith.constant 4.471500e-02 : f32
    %234 = vector.broadcast %cst_90 : f32 to vector<16x128xf32>
    %235 = arith.mulf %234, %233 : vector<16x128xf32>
    %236 = arith.addf %229, %235 : vector<16x128xf32>
    %cst_91 = arith.constant 0.797884583 : f32
    %237 = vector.broadcast %cst_91 : f32 to vector<16x128xf32>
    %238 = arith.mulf %237, %236 : vector<16x128xf32>
    %239 = math.tanh %238 : vector<16x128xf32>
    %cst_92 = arith.constant 1.000000e+00 : f32
    %240 = vector.broadcast %cst_92 : f32 to vector<16x128xf32>
    %241 = arith.addf %240, %239 : vector<16x128xf32>
    %242 = arith.mulf %231, %241 : vector<16x128xf32>
    %243 = arith.truncf %242 : vector<16x128xf32> to vector<16x128xbf16>
    %c0_93 = arith.constant 0 : index
    %c0_94 = arith.constant 0 : index
    %c0_95 = arith.constant 0 : index
    %244 = vector.load %arg16[%c0_93, %c0_94, %c0_95] : memref<1x128x32xbf16, #tpu.memory_space<vmem>>, vector<1x128x32xbf16>
    %245 = vector.shape_cast %244 : vector<1x128x32xbf16> to vector<128x32xbf16>
    %cst_96 = arith.constant dense<0.000000e+00> : vector<16x32xf32>
    %246 = tpu.matmul %243, %245, %cst_96 {dimension_numbers = #tpu.dot_dimension_numbers<[1], [0], [0], [1], [0, 0, 1, 1], [], []>} : vector<16x128xbf16>, vector<128x32xbf16>, vector<16x32xf32> -> vector<16x32xf32>
    %c0_97 = arith.constant 0 : index
    %c0_98 = arith.constant 0 : index
    %c0_99 = arith.constant 0 : index
    %247 = vector.load %arg17[%c0_97, %c0_98, %c0_99] : memref<1x1x32xbf16, #tpu.memory_space<vmem>>, vector<1x1x32xbf16>
    %248 = vector.shape_cast %247 : vector<1x1x32xbf16> to vector<1x32xbf16>
    %249 = arith.extf %248 : vector<1x32xbf16> to vector<1x32xf32>
    %250 = vector.broadcast %249 : vector<1x32xf32> to vector<16x32xf32>
    %251 = arith.addf %246, %250 : vector<16x32xf32>
    %252 = arith.addf %220, %251 : vector<16x32xf32>
    %c0_100 = arith.constant 0 : index
    %c0_101 = arith.constant 0 : index
    %c0_102 = arith.constant 0 : index
    %253 = vector.load %arg18[%c0_100, %c0_101, %c0_102] : memref<1x1x32xbf16, #tpu.memory_space<vmem>>, vector<1x1x32xbf16>
    %254 = vector.shape_cast %253 : vector<1x1x32xbf16> to vector<1x32xbf16>
    %255 = arith.extf %254 : vector<1x32xbf16> to vector<1x32xf32>
    %c0_103 = arith.constant 0 : index
    %c0_104 = arith.constant 0 : index
    %c0_105 = arith.constant 0 : index
    %256 = vector.load %arg19[%c0_103, %c0_104, %c0_105] : memref<1x1x32xbf16, #tpu.memory_space<vmem>>, vector<1x1x32xbf16>
    %257 = vector.shape_cast %256 : vector<1x1x32xbf16> to vector<1x32xbf16>
    %258 = arith.extf %257 : vector<1x32xbf16> to vector<1x32xf32>
    %cst_106 = arith.constant dense<0.000000e+00> : vector<16xf32>
    %259 = vector.multi_reduction <add>, %252, %cst_106 [1] : vector<16x32xf32> to vector<16xf32>
    %260 = vector.shape_cast %259 : vector<16xf32> to vector<16x1xf32>
    %cst_107 = arith.constant 3.200000e+01 : f32
    %261 = vector.broadcast %cst_107 : f32 to vector<16x1xf32>
    %262 = arith.divf %260, %261 : vector<16x1xf32>
    %263 = vector.broadcast %262 : vector<16x1xf32> to vector<16x32xf32>
    %264 = arith.subf %252, %263 : vector<16x32xf32>
    %265 = arith.mulf %264, %264 : vector<16x32xf32>
    %cst_108 = arith.constant dense<0.000000e+00> : vector<16xf32>
    %266 = vector.multi_reduction <add>, %265, %cst_108 [1] : vector<16x32xf32> to vector<16xf32>
    %267 = vector.shape_cast %266 : vector<16xf32> to vector<16x1xf32>
    %cst_109 = arith.constant 3.200000e+01 : f32
    %268 = vector.broadcast %cst_109 : f32 to vector<16x1xf32>
    %269 = arith.divf %267, %268 : vector<16x1xf32>
    %270 = vector.broadcast %262 : vector<16x1xf32> to vector<16x32xf32>
    %271 = arith.subf %252, %270 : vector<16x32xf32>
    %cst_110 = arith.constant 9.99999974E-6 : f32
    %272 = vector.broadcast %cst_110 : f32 to vector<16x1xf32>
    %273 = arith.addf %269, %272 : vector<16x1xf32>
    %274 = math.rsqrt %273 : vector<16x1xf32>
    %275 = vector.broadcast %274 : vector<16x1xf32> to vector<16x32xf32>
    %276 = arith.mulf %271, %275 : vector<16x32xf32>
    %277 = vector.broadcast %255 : vector<1x32xf32> to vector<16x32xf32>
    %278 = arith.mulf %276, %277 : vector<16x32xf32>
    %279 = vector.broadcast %258 : vector<1x32xf32> to vector<16x32xf32>
    %280 = arith.addf %278, %279 : vector<16x32xf32>
    %281 = arith.truncf %280 : vector<16x32xf32> to vector<16x32xbf16>
    %c0_111 = arith.constant 0 : index
    %c0_112 = arith.constant 0 : index
    %282 = vector.load %arg21[%c0_111, %c0_112] : memref<16x32xbf16, #tpu.memory_space<vmem>>, vector<16x32xbf16>
    tpu.vector_store %arg21[%c0_111, %c0_112], %281 {strides = array<i32>} : memref<16x32xbf16, #tpu.memory_space<vmem>>, vector<16x32xbf16>,
    %c1_i32 = arith.constant 1 : i32
    %283 = arith.cmpi eq, %arg1, %c1_i32 : i32
    %284 = arith.extui %283 : i1 to i32
    %c0_i32_113 = arith.constant 0 : i32
    %285 = arith.cmpi ne, %284, %c0_i32_113 : i32
    scf.if %285 {
      %c0_114 = arith.constant 0 : index
      %c0_115 = arith.constant 0 : index
      %c0_116 = arith.constant 0 : index
      %286 = vector.load %arg20[%c0_114, %c0_115, %c0_116] : memref<1x16x32xbf16, #tpu.memory_space<vmem>>, vector<1x16x32xbf16>
      %287 = vector.shape_cast %286 : vector<1x16x32xbf16> to vector<16x32xbf16>
      %288 = vector.shape_cast %281 : vector<16x32xbf16> to vector<1x16x32xbf16>
      tpu.vector_store %arg20[%c0_114, %c0_115, %c0_116], %288 {strides = array<i32>} : memref<1x16x32xbf16, #tpu.memory_space<vmem>>, vector<1x16x32xbf16>,
    } else {
    }
    return
  }
  func.func @transform_0(%arg0: i32, %arg1: i32) -> (i32, i32) {
    %c0_i32 = arith.constant 0 : i32
    %c0_i32_0 = arith.constant 0 : i32
    %c0_i32_1 = arith.constant 0 : i32
    return %c0_i32, %c0_i32_0 : i32, i32
  }
  func.func @transform_1(%arg0: i32, %arg1: i32) -> (i32, i32, i32) {
    %c0_i32 = arith.constant 0 : i32
    %c0_i32_0 = arith.constant 0 : i32
    %c0_i32_1 = arith.constant 0 : i32
    return %arg0, %c0_i32, %c0_i32_0 : i32, i32, i32
  }
  func.func @transform_2(%arg0: i32, %arg1: i32) -> (i32, i32, i32) {
    %c0_i32 = arith.constant 0 : i32
    %c0_i32_0 = arith.constant 0 : i32
    %c0_i32_1 = arith.constant 0 : i32
    return %arg1, %c0_i32, %c0_i32_0 : i32, i32, i32
  }
  func.func @transform_3(%arg0: i32, %arg1: i32) -> (i32, i32, i32) {
    %c0_i32 = arith.constant 0 : i32
    %c0_i32_0 = arith.constant 0 : i32
    %c0_i32_1 = arith.constant 0 : i32
    return %arg1, %c0_i32, %c0_i32_0 : i32, i32, i32
  }
  func.func @transform_4(%arg0: i32, %arg1: i32) -> (i32, i32, i32) {
    %c0_i32 = arith.constant 0 : i32
    %c0_i32_0 = arith.constant 0 : i32
    %c0_i32_1 = arith.constant 0 : i32
    return %arg1, %c0_i32, %c0_i32_0 : i32, i32, i32
  }
  func.func @transform_5(%arg0: i32, %arg1: i32) -> (i32, i32, i32) {
    %c0_i32 = arith.constant 0 : i32
    %c0_i32_0 = arith.constant 0 : i32
    %c0_i32_1 = arith.constant 0 : i32
    return %arg1, %c0_i32, %c0_i32_0 : i32, i32, i32
  }
  func.func @transform_6(%arg0: i32, %arg1: i32) -> (i32, i32, i32) {
    %c0_i32 = arith.constant 0 : i32
    %c0_i32_0 = arith.constant 0 : i32
    %c0_i32_1 = arith.constant 0 : i32
    return %arg1, %c0_i32, %c0_i32_0 : i32, i32, i32
  }
  func.func @transform_7(%arg0: i32, %arg1: i32) -> (i32, i32, i32) {
    %c0_i32 = arith.constant 0 : i32
    %c0_i32_0 = arith.constant 0 : i32
    %c0_i32_1 = arith.constant 0 : i32
    return %arg1, %c0_i32, %c0_i32_0 : i32, i32, i32
  }
  func.func @transform_8(%arg0: i32, %arg1: i32) -> (i32, i32, i32) {
    %c0_i32 = arith.constant 0 : i32
    %c0_i32_0 = arith.constant 0 : i32
    %c0_i32_1 = arith.constant 0 : i32
    return %arg1, %c0_i32, %c0_i32_0 : i32, i32, i32
  }
  func.func @transform_9(%arg0: i32, %arg1: i32) -> (i32, i32, i32) {
    %c0_i32 = arith.constant 0 : i32
    %c0_i32_0 = arith.constant 0 : i32
    %c0_i32_1 = arith.constant 0 : i32
    return %arg1, %c0_i32, %c0_i32_0 : i32, i32, i32
  }
  func.func @transform_10(%arg0: i32, %arg1: i32) -> (i32, i32, i32) {
    %c0_i32 = arith.constant 0 : i32
    %c0_i32_0 = arith.constant 0 : i32
    %c0_i32_1 = arith.constant 0 : i32
    return %arg1, %c0_i32, %c0_i32_0 : i32, i32, i32
  }
  func.func @transform_11(%arg0: i32, %arg1: i32) -> (i32, i32, i32) {
    %c0_i32 = arith.constant 0 : i32
    %c0_i32_0 = arith.constant 0 : i32
    %c0_i32_1 = arith.constant 0 : i32
    return %arg1, %c0_i32, %c0_i32_0 : i32, i32, i32
  }
  func.func @transform_12(%arg0: i32, %arg1: i32) -> (i32, i32, i32) {
    %c0_i32 = arith.constant 0 : i32
    %c0_i32_0 = arith.constant 0 : i32
    %c0_i32_1 = arith.constant 0 : i32
    return %arg1, %c0_i32, %c0_i32_0 : i32, i32, i32
  }
  func.func @transform_13(%arg0: i32, %arg1: i32) -> (i32, i32, i32) {
    %c0_i32 = arith.constant 0 : i32
    %c0_i32_0 = arith.constant 0 : i32
    %c0_i32_1 = arith.constant 0 : i32
    return %arg1, %c0_i32, %c0_i32_0 : i32, i32, i32
  }
  func.func @transform_14(%arg0: i32, %arg1: i32) -> (i32, i32, i32) {
    %c0_i32 = arith.constant 0 : i32
    %c0_i32_0 = arith.constant 0 : i32
    %c0_i32_1 = arith.constant 0 : i32
    return %arg1, %c0_i32, %c0_i32_0 : i32, i32, i32
  }
  func.func @transform_15(%arg0: i32, %arg1: i32) -> (i32, i32, i32) {
    %c0_i32 = arith.constant 0 : i32
    %c0_i32_0 = arith.constant 0 : i32
    %c0_i32_1 = arith.constant 0 : i32
    return %arg1, %c0_i32, %c0_i32_0 : i32, i32, i32
  }
  func.func @transform_16(%arg0: i32, %arg1: i32) -> (i32, i32, i32) {
    %c0_i32 = arith.constant 0 : i32
    %c0_i32_0 = arith.constant 0 : i32
    %c0_i32_1 = arith.constant 0 : i32
    return %arg1, %c0_i32, %c0_i32_0 : i32, i32, i32
  }
  func.func @transform_17(%arg0: i32, %arg1: i32) -> (i32, i32, i32) {
    %c0_i32 = arith.constant 0 : i32
    %c0_i32_0 = arith.constant 0 : i32
    %c0_i32_1 = arith.constant 0 : i32
    return %arg1, %c0_i32, %c0_i32_0 : i32, i32, i32
  }
  func.func @transform_18(%arg0: i32, %arg1: i32) -> (i32, i32, i32) {
    %c0_i32 = arith.constant 0 : i32
    %c0_i32_0 = arith.constant 0 : i32
    %c0_i32_1 = arith.constant 0 : i32
    return %arg0, %c0_i32, %c0_i32_0 : i32, i32, i32
  }
}

</mosaic_0001>

<bundles_post_ra>
// kernel: tpu_custom_call.1
= control target key start
LH: loop header
LB: loop body
LE: loop exit
PB: predicated region body
PF: predicated region fallthrough
CT: control target
= control target key end

     0   :  { %s4116_s0 = inlined_call_operand.vmem [shape: bf16[16,32], index: 0, kind: input, shape index: {}]   ;;  %s4117_s1 = inlined_call_operand.vmem [shape: bf16[2,8,32], index: 1, kind: input, shape index: {}]   ;;  %s4118_s2 = inlined_call_operand.vmem [shape: bf16[2,32,32], index: 2, kind: input, shape index: {}]   ;;  %s4119_s3 = inlined_call_operand.vmem [shape: bf16[2,32,32], index: 3, kind: input, shape index: {}]   ;;  %s4120_s4 = inlined_call_operand.vmem [shape: bf16[2,32,32], index: 4, kind: input, shape index: {}]   ;;  %s4121_s5 = inlined_call_operand.vmem [shape: bf16[2,1,32], index: 5, kind: input, shape index: {}]   ;;  %s4122_s6 = inlined_call_operand.vmem [shape: bf16[2,1,32], index: 6, kind: input, shape index: {}]   ;;  %s4123_s7 = inlined_call_operand.vmem [shape: bf16[2,1,32], index: 7, kind: input, shape index: {}]   ;;  %s4124_s8 = inlined_call_operand.vmem [shape: bf16[2,32,32], index: 8, kind: input, shape index: {}]   ;;  %s4125_s9 = inlined_call_operand.vmem [shape: bf16[2,1,32], index: 9, kind: input, shape index: {}]   ;;  %s4126_s10 = inlined_call_operand.vmem [shape: bf16[2,1,32], index: 10, kind: input, shape index: {}]   ;;  %s4127_s11 = inlined_call_operand.vmem [shape: bf16[2,1,32], index: 11, kind: input, shape index: {}]   ;;  %s4128_s12 = inlined_call_operand.vmem [shape: bf16[2,32,128], index: 12, kind: input, shape index: {}]   ;;  %s4129_s13 = inlined_call_operand.vmem [shape: bf16[2,1,128], index: 13, kind: input, shape index: {}]   ;;  %s4130_s14 = inlined_call_operand.vmem [shape: bf16[2,128,32], index: 14, kind: input, shape index: {}]   ;;  %s4131_s15 = inlined_call_operand.vmem [shape: bf16[2,1,32], index: 15, kind: input, shape index: {}]   ;;  %s4132_s16 = inlined_call_operand.vmem [shape: bf16[2,1,32], index: 16, kind: input, shape index: {}]   ;;  %s4133_s17 = inlined_call_operand.vmem [shape: bf16[2,1,32], index: 17, kind: input, shape index: {}]   ;;  %s4134_s18 = inlined_call_operand.hbm [shape: bf16[2,16,32], index: 18, kind: output, shape index: {}]  }
   0x1   :  { %4152 = sst [smem:[#allocation22_spill]] %s4116_s0 }
   0x2   :  { %4153 = sst [smem:[#allocation23_spill]] %s4117_s1 }
   0x3   :  { %4154 = sst [smem:[#allocation24_spill]] %s4118_s2 }
   0x4   :  { %4155 = sst [smem:[#allocation25_spill]] %s4119_s3 }
   0x5   :  { %4156 = sst [smem:[#allocation26_spill]] %s4120_s4 }
   0x6   :  { %4157 = sst [smem:[#allocation27_spill]] %s4124_s8 }
   0x7   :  { %4158 = sst [smem:[#allocation28_spill]] %s4127_s11 }
   0x8   :  { %4159 = sst [smem:[#allocation29_spill]] %s4128_s12 }
   0x9   :  { %4160 = sst [smem:[#allocation30_spill]] %s4132_s16 }
   0xa   :  { %4161 = sst [smem:[#allocation31_spill]] %s4133_s17 }
   0xb   :  { %4162 = sst [smem:[#allocation32_spill]] %s4134_s18 }
   0xc   :  { %23 = vsyncpa [#allocation4], 0 }
   0xd   :  { %25 = vsyncpa [#allocation4 + $0x1], 0  ;;  %s3563_s27 = smov 0   ;;  %s3565_s28 = smov 0  }
   0xe   :  { %s3567_s29 = smov 0   ;;  %s3569_s30 = smov 0  }
   0xf   :  { %s3571_s0 = smov 0   ;;  %s3573_s19 = smov 0  }
  0x10   :  { %s3575_s1 = smov 0   ;;  %s3577_s20 = smov 0  }
  0x11 LB: > { %4163 = sst [smem:[#allocation6_spill]] %s3430_s27  ;;  %s2857_s21 = sadd.s32 4294967295, %s3458_s20   ;;  %s3458_s20 = sphi %s3577_s20, %s31_s20   ;;  %s3454_s1 = sphi %s3575_s1, %s4220_s1   ;;  %s3450_s19 = sphi %s3573_s19, %s4219_s19   ;;  %s3446_s0 = sphi %s3571_s0, %s4218_s0   ;;  %s3442_s30 = sphi %s3569_s30, %s4217_s30   ;;  %s3438_s29 = sphi %s3567_s29, %s4216_s29   ;;  %s3434_s28 = sphi %s3565_s28, %s4215_s28   ;;  %s3430_s27 = sphi %s3563_s27, %s4214_s27  }
  0x12   : > { %4164 = sst [smem:[#allocation7_spill]] %s3434_s28  ;;  %s2858_s22 = sadd.s32 4294967294, %s3458_s20  }
  0x13   : > { %4165 = sst [smem:[#allocation8_spill]] %s3438_s29  ;;  %s40_s2 = sadd.s32 1, %s3450_s19 }
  0x14   : > { %4166 = sst [smem:[#allocation9_spill]] %s3442_s30  ;;  %p41_p0 = scmp.ge.s32.totalorder %s40_s2, 2 }
  0x15   : > { %4167 = sst [smem:[#allocation10_spill]] %s3446_s0  ;;  %s43_s23 = sadd.s32 1, %s3454_s1 }
  0x16   : > { %4168 = sst [smem:[#allocation11_spill]] %s3450_s19  ;;  %p523_p1 = scmp.ne.s32.totalorder %s3438_s29, %s3434_s28 }
  0x17   : > { %4169 = sst [smem:[#allocation12_spill]] %s3454_s1  ;;  %p524_p2 = scmp.eq.s32.totalorder %s2857_s21, 3 }
  0x18   : > { %4170 = sst [smem:[#allocation13_spill]] %s3458_s20  ;;  %s4222_s2 = smov (%p41_p0, %s40_s2), 0 }
  0x19   : > { %4171 = sst [smem:[#allocation14_spill]] %s4222_s2  ;;  %s4224_s23 = smov (!%p41_p0, %s43_s23), %s3454_s1 }
  0x1a   : > { %p3612_p3 = por %p524_p2, %p523_p1  ;;  %p529_p4 = scmp.ne.s32.totalorder %s3434_s28, %s3430_s27 }
  0x1b   : > { %p45_p5 = scmp.ge.s32.totalorder %s4224_s23, 2  ;;  %p530_p6 = scmp.eq.s32.totalorder %s2858_s22, 3 }
  0x1c   : > { %s4172_s24 = scalar_select %p3612_p3, 1, 0 }
  0x1d   : > { %p2861_p7 = scmp.ge.s32.totalorder %s3458_s20, 1  ;;  %p666_p8 = scmp.lt.s32.totalorder %s3458_s20, 5 }
  0x1e   : > { %4173 = sst [smem:[#allocation15_spill]] %s4172_s24  ;;  %s4226_s23 = smov (%p45_p5, %s4224_s23), 0 }
  0x1f   : > { %4174 = sst [smem:[#allocation16_spill]] %s4226_s23  ;;  %p3622_p9 = por %p530_p6, %p529_p4 }
  0x20   : > { %p667_p10 = pnand %p2861_p7, %p666_p8  ;;  %s510_s26 = ssub.s32 %s3454_s1, %s4226_s23 }
  0x21   : > { %s4175_s25 = scalar_select %p3622_p9, 1, 0 }
  0x22   : > { %s513_s21 = sadd.s32 1, %s3438_s29  ;;  %p511_p11 = scmp.eq.s32.totalorder %s510_s26, 0 }
  0x23   : > { %4176 = sst [smem:[#allocation17_spill]] %s4175_s25  ;;  %670 = sbr.rel (%p667_p10) target bundleno = 3623 (0xe27), region = 92 }
  0x24   : > { %s3630_s2 = scalar_select %p511_p11, %s3438_s29, %s513_s21  }
  0x26   : > { %4177 = sst [smem:[#allocation18_spill]] %s3630_s2 }
  0x2a   : > { %s4140_s22 = sand.u32 1, %s3434_s28   ;;  %p779_p12 = scmp.lt.s32.totalorder %s3446_s0, 1 }
  0x2b   : > { %s2862_s19 = sshll.u32 %s4140_s22, 3  ;;  %p783_p13 = scmp.lt.s32.totalorder %s3442_s30, 1 }
  0x2c   : > { %s780_s27 = scalar_select %p779_p12, %s3446_s0, 1 }
  0x2d   : > { %s3639_s25 = scalar_select %p783_p13, %s3442_s30, 1 }
  0x2e   : > { %s2863_s26 = sshll.u32 %s780_s27, 2  ;;  %s4178_s1 = sld [smem:[#allocation23_spill]] }
  0x2f   : > { %s2928_s22 = sshll.u32 %s3639_s25, 4  ;;  %s4180_s18 = sld [smem:[#allocation24_spill]] }
  0x30   : > { %s4181_s3 = sld [smem:[#allocation25_spill]]  ;;  %s4183_s4 = sld [smem:[#allocation26_spill]] }
  0x31   : > { %s4185_s8 = sld [smem:[#allocation27_spill]]  ;;  %s4187_s12 = sld [smem:[#allocation29_spill]] }
  0x32   : > { %s828_s28 = scalar_lea.vmem %s4129_s13, %s3639_s25  ;;  %s4188_s21 = sld [smem:[#allocation30_spill]] }
  0x33   : > { %s4190_s0 = sld [smem:[#allocation9_spill]] }
  0x34   : > { %s3644_s2 = scalar_lea.vmem %s4178_s1, %s2863_s26 }
  0x35   : > { %4179 = sst [smem:[#allocation19_spill]] %s3644_s2  ;;  %s787_s24 = scalar_lea.vmem %s4180_s18, %s2928_s22 }
  0x36   : > { %s3653_s30 = scalar_lea.vmem %s4181_s3, %s2928_s22  ;;  %s3658_s16 = scalar_lea.vmem %s4183_s4, %s2928_s22 }
  0x37   : > { %4182 = sst [smem:[#allocation20_spill]] %s3653_s30  ;;  %s3675_s30 = scalar_lea.vmem %s4185_s8, %s2928_s22 }
  0x38   : > { %4184 = sst [smem:[#allocation21_spill]] %s3658_s16  ;;  %s3692_s20 = scalar_lea.vmem %s4187_s12, %s2928_s22 }
  0x39   : > { %s2933_s8 = sshll.u32 %s3639_s25, 6  ;;  %s839_s29 = scalar_lea.vmem %s4188_s21, %s3639_s25 }
  0x3a   : > { %s3706_s1 = scalar_lea.vmem %s4130_s14, %s2933_s8  ;;  %s4189_s12 = sld [smem:[#allocation31_spill]] }
  0x3b   : > { %s3716_s3 = scalar_lea.vmem [#allocation3], %s2862_s19  ;;  %p2876_p0 = scmp.ne.s32.totalorder %s4190_s0, 0 }
  0x3c   : > { %s4191_s4 = sld [smem:[#allocation22_spill]] (!%p2876_p0)  ;;  %vm856_vm0 = vcmask (!%p2876_p0), 261120  }
  0x3d   : > { %847 = sbr.rel (%p2876_p0) target bundleno = 68 (0x44), region = 96 }
  0x40   : > { %s842_s11 = scalar_lea.vmem %s4189_s12, %s3639_s25 }
  0x42   : > { %v3286_v0 = vld [vmem:[%s4191_s4] sm:$0xff] (!%p2876_p0)  }
  0x43   : > { %857 = vst.msk [vmem:[#allocation2] sm:$0xff] (!%p2876_p0), %vm856_vm0, %v3286_v0 }
  0x44 PF: > { %v3287_v1 = vld [vmem:[%s787_s24] sm:$0xff]   ;;  %s4192_s8 = sld [smem:[#allocation20_spill]]  ;;  %v3460_v2 = vmov 0.0   ;;  %v3288_v3 = vld [vmem:[%s787_s24 + $0x8] sm:$0xff]   ;;  %s4193_s12 = sld [smem:[#allocation19_spill]]  ;;  %vm3461_vm1 = vmmov 0   ;;  %v884_v10 = vlaneseq }
  0x45   : > { %3004 = vmatprep.subr.bf16.mxu1 %v3460_v2  ;;  %3036 = vmatprep.subr.bf16.mxu0 %v3460_v2  ;;  %vm900_vm2 = vcmask 261120   ;;  %s4194_s4 = sld [smem:[#allocation21_spill]]  ;;  %s4195_s21 = scalar_lea.vmem %s4121_s5, %s3639_s25  ;;  %vm1149_vm3 = vcmask 64512   ;;  %vm1247_vm4 = vcmask 130048   ;;  %vm1333_vm5 = vcmask 1043456  }
  0x46   : > { %3005 = vmatpush3.bf16.msra.mxu1 %v3287_v1  ;;  %3008 = vmatprep.mubr.msk.bf16.mxu1 %vm3461_vm1, %v3460_v2  ;;  %v885_v11 = vshrl.u32 %v884_v10, 7  ;;  %v876_v12 = vld [vmem:[%s4195_s21] sm:$0x1]  ;;  %s4196_s26 = scalar_lea.vmem %s4122_s6, %s3639_s25  ;;  %s3462_s2 = smov 120  }
  0x47   : > { %3006 = vmatprep.subr.bf16.mxu1 %v3460_v2  ;;  %3040 = vmatprep.mubr.msk.bf16.mxu0 %vm3461_vm1, %v3460_v2  ;;  %v877_v13 = vunpack.c.l.bf16 %v876_v12  ;;  %v878_v16 = vld [vmem:[%s4196_s26] sm:$0x1]  ;;  %s4197_s0 = scalar_lea.vmem %s4123_s7, %s3639_s25  ;;  %s3463_s17 = smov 112  }
  0x48   : > { %v3763_v14 = vsub.s32 0, %v885_v11  ;;  %v879_v20 = vunpack.c.l.bf16 %v878_v16  ;;  %v880_v43 = vld [vmem:[%s4197_s0] sm:$0x1]  ;;  %s3464_s27 = smov 104   ;;  %s4199_s24 = scalar_lea.vmem %s4126_s10, %s3639_s25 }
  0x49   : > { %v881_v44 = vunpack.c.l.bf16 %v880_v43  ;;  %s4200_s16 = sld [smem:[#allocation28_spill]]  ;;  %s4202_s22 = scalar_lea.vmem %s4131_s15, %s3639_s25 }
  0x4a   : > { %v858_v4 = vld [vmem:[#allocation2] sm:$0xff]  ;;  %3007 = vmatpush3.bf16.msra.mxu1 %v3288_v3  ;;  %v3290_v6 = vld [vmem:[%s4192_s8 + $0x8] sm:$0xff]   ;;  %v887_v15 = vrot.slane %v877_v13, %v3763_v14  ;;  %v951_v26 = vrot.slane %v879_v20, %v3763_v14 }
  0x4b   : > { %v3289_v5 = vld [vmem:[%s4192_s8] sm:$0xff]   ;;  %3012 = vmatprep.subr.bf16.mxu1 %v3460_v2  ;;  %v3292_v9 = vld [vmem:[%s4194_s4 + $0x8] sm:$0xff]   ;;  %v1053_v45 = vrot.slane %v881_v44, %v3763_v14 }
  0x4c   : > { %v859_v7 = vld [vmem:[%s4193_s12] sm:$0xf]  ;;  %s4198_s12 = scalar_lea.vmem %s4125_s9, %s3639_s25 }
  0x4d   : > { %3009 = vmatmul.mubr.msk.bf16.vlgmr.msra.gmra.mrb[0].mxu1 %vm900_vm2, %v858_v4  ;;  %v3291_v8 = vld [vmem:[%s4194_s4] sm:$0xff]  }
  0x4e   : > { %3013 = vmatpush3.bf16.msra.mxu1 %v3289_v5  ;;  %3016 = vmatprep.mubr.msk.bf16.mxu1 %vm3461_vm1, %v3460_v2 }
  0x4f   : > { %3014 = vmatprep.subr.bf16.mxu1 %v3460_v2  ;;  %3037 = vmatpush3.bf16.msra.mxu0 %v3291_v8  ;;  %s4201_s23 = scalar_lea.vmem %s4200_s16, %s3639_s25 }
  0x50   : > { %3038 = vmatprep.subr.bf16.mxu0 %v3460_v2 }
  0x52   : > { %3015 = vmatpush3.bf16.msra.mxu1 %v3290_v6 }
  0x53   : > { %3020 = vmatprep.subr.bf16.mxu1 %v3460_v2  ;;  %3039 = vmatpush3.bf16.msra.mxu0 %v3292_v9 }
  0x54   : > { %3050 = vmatprep.subr.bf16.mxu0 %v3460_v2 }
  0x55   : > { %3017 = vmatmul.mubr.msk.bf16.vlgmr.msra.gmra.mrb[4].mxu1 %vm900_vm2, %v859_v7 }
  0x56   : > { %3021 = vmatpush3.bf16.msra.mxu1 %v3289_v5  ;;  %3024 = vmatprep.mubr.msk.bf16.mxu1 %vm3461_vm1, %v3460_v2 }
  0x57   : > { %3022 = vmatprep.subr.bf16.mxu1 %v3460_v2  ;;  %3041 = vmatmul.mubr.msk.bf16.vlgmr.msra.gmra.mrb[0].mxu0 %vm900_vm2, %v858_v4 }
  0x58   : > { %3052 = vmatprep.mubr.msk.bf16.mxu0 %vm3461_vm1, %v3460_v2 }
  0x5a   : > { %3023 = vmatpush3.bf16.msra.mxu1 %v3290_v6 }
  0x5b   : > { %3028 = vmatprep.subr.bf16.mxu1 %v3460_v2 }
  0x5d   : > { %3025 = vmatmul.mubr.msk.bf16.vlgmr.msra.gmra.mrb[8].mxu1 %vm900_vm2, %v858_v4 }
  0x5e   : > { %3032 = vmatprep.mubr.msk.bf16.mxu1 %vm3461_vm1, %v3460_v2  ;;  %3029 = vmatpush3.bf16.msra.mxu1 %v3291_v8 }
  0x5f   : > { %3030 = vmatprep.subr.bf16.mxu1 %v3460_v2 }
  0x62   : > { %3031 = vmatpush3.bf16.msra.mxu1 %v3292_v9 }
  0x63   : > { %3044 = vmatprep.subr.bf16.mxu1 %v3460_v2 }
  0x65   : > { %3033 = vmatmul.mubr.msk.bf16.vlgmr.msra.gmra.mrb[12].mxu1 %vm900_vm2, %v859_v7 }
  0x66   : > { %3046 = vmatprep.mubr.msk.bf16.mxu1 %vm3461_vm1, %v3460_v2 }
 0x120   : > { %v938_v17 = vpop.f32.mrb[0].mxu1 }
 0x121   : > { %v939_v18 = vadd.f32 %v938_v17, %v887_v15  ;;  %v3010_v19 = vpop.f32.mrb[1].mxu1 }
 0x122   : > { %v941_v21 = vpop.f32.mrb[2].mxu1 }
 0x123   : > { %v942_v22 = vadd.f32 %v941_v21, %v887_v15  ;;  %v3011_v23 = vpop.f32.mrb[3].mxu1  ;;  %v945_v24 = vmul.f32 0.35355338, %v939_v18 }
 0x125   : > { %v946_v25 = vmul.f32 0.35355338, %v942_v22 }
 0x127   : > { %v3772_v27 = vpack.c.bf16 %v946_v25, %v945_v24 }
 0x128   : > { %v1001_v28 = vpop.f32.mrb[4].mxu1 }
 0x129   : > { %v1002_v29 = vadd.f32 %v1001_v28, %v951_v26  ;;  %v3018_v30 = vpop.f32.mrb[5].mxu1 }
 0x12a   : > { %v1004_v31 = vpop.f32.mrb[6].mxu1  ;;  %v1141_v51 = vpop.f32.mrb[0].mxu0 }
 0x12b   : > { %v3774_v32 = vpack.c.bf16 %v1002_v29, %v1002_v29  ;;  %v3019_v33 = vpop.f32.mrb[7].mxu1  ;;  %v1142_v52 = vadd.f32 %v1141_v51, %v1053_v45  ;;  %v3042_v53 = vpop.f32.mrb[1].mxu0 }
 0x12c   : > { %v1144_v54 = vpop.f32.mrb[2].mxu0 }
 0x12d   : > { %1385 = vrot.lane.b32.xlu0 %v3774_v32, %s3462_s2  ;;  %v1154_v34 = vsel %vm1149_vm3, %v3774_v32, 0  ;;  %v1145_v55 = vadd.f32 %v1144_v54, %v1053_v45  ;;  %v3043_v56 = vpop.f32.mrb[3].mxu0 }
 0x12e   : > { %3045 = vmatpush3.bf16.xpose.msra.mxu1 %v1154_v34 }
 0x12f   : > { %3056 = vmatprep.subr.bf16.mxu1 %v3460_v2  ;;  %v3804_v57 = vpack.c.bf16 %v1145_v55, %v1142_v52 }
 0x130   : > { %v1042_v35 = vpop.f32.mrb[8].mxu1 }
 0x131   : > { %1382 = vrot.lane.b32.xlu0 %v3772_v27, %s3462_s2  ;;  %v3026_v36 = vpop.f32.mrb[9].mxu1  ;;  %v1043_v38 = vadd.f32 %v1042_v35, %v951_v26 }
 0x132   : > { %v1045_v37 = vpop.f32.mrb[10].mxu1 }
 0x133   : > { %v1046_v39 = vadd.f32 %v1045_v37, %v951_v26  ;;  %v3027_v40 = vpop.f32.mrb[11].mxu1 }
 0x135   : > { %v3783_v41 = vpack.c.bf16 %v1046_v39, %v1043_v38  ;;  %3047 = vmatmul.mubr.msk.bf16.vlgmr.msra.gmra.mrb[16].mxu1 %vm1149_vm3, %v3772_v27 }
 0x136   : > { %3058 = vmatprep.mubr.msk.bf16.mxu1 %vm3461_vm1, %v3460_v2  ;;  %3057 = vmatpush3.bf16.msra.mxu1 %v3804_v57 }
 0x137   : > { %1435 = vrot.lane.b32.xlu1 %v3783_v41, %s3462_s2  ;;  %v1198_v42 = vsel %vm1149_vm3, %v3783_v41, 0  ;;  %3062 = vmatprep.subr.bf16.mxu1 %v3460_v2 }
 0x138   : > { %3051 = vmatpush3.bf16.xpose.msra.mxu0 %v1198_v42  ;;  %v1100_v46 = vpop.f32.mrb[12].mxu1 }
 0x139   : > { %3068 = vmatprep.subr.bf16.mxu0 %v3460_v2  ;;  %v1101_v47 = vadd.f32 %v1100_v46, %v1053_v45  ;;  %v3034_v48 = vpop.f32.mrb[13].mxu1 }
 0x13a   : > { %v1103_v49 = vpop.f32.mrb[14].mxu1 }
 0x13b   : > { %v3035_v50 = vpop.f32.mrb[15].mxu1  ;;  %v3829_v25 = vpack.c.bf16 %v1101_v47, %v1101_v47 }
 0x13d   : > { %v1335_v49 = vsel %vm1333_vm5, %v3829_v25, 0 }
 0x13f   : > { %3053 = vmatmul.mubr.msk.bf16.vlgmr.msra.gmra.mrb[4].mxu0 %vm1149_vm3, %v3772_v27 }
 0x140   : > { %3070 = vmatprep.mubr.msk.bf16.mxu0 %vm3461_vm1, %v3460_v2 }
 0x19f   : > { %v1386_v58 = vpop.permute.xlu0 %1385 }
 0x1a0   : > { %v1391_v59 = vsel %vm1149_vm3, %v1386_v58, 0 }
 0x1a1   : > { %3069 = vmatpush3.bf16.xpose.msra.mxu0 %v1391_v59 }
 0x1a2   : > { %3074 = vmatprep.subr.bf16.mxu0 %v3460_v2 }
 0x1a3   : > { %v1383_v60 = vpop.permute.xlu0 %1382 }
 0x1a8   : > { %3071 = vmatmul.mubr.msk.bf16.vlgmr.msra.gmra.mrb[8].mxu0 %vm1149_vm3, %v1383_v60 }
 0x1a9   : > { %v1436_v61 = vpop.permute.xlu1 %1435  ;;  %3076 = vmatprep.mubr.msk.bf16.mxu0 %vm3461_vm1, %v3460_v2 }
 0x1aa   : > { %v1438_v62 = vsel %vm1149_vm3, %v1436_v61, 0 }
 0x1ab   : > { %3075 = vmatpush3.bf16.xpose.msra.mxu0 %v1438_v62 }
 0x1ac   : > { %3092 = vmatprep.subr.bf16.mxu0 %v3460_v2 }
 0x1b2   : > { %3077 = vmatmul.mubr.msk.bf16.vlgmr.msra.gmra.mrb[12].mxu0 %vm1149_vm3, %v1383_v60 }
 0x1b3   : > { %3094 = vmatprep.mubr.msk.bf16.mxu0 %vm3461_vm1, %v3460_v2 }
 0x208   : > { %v1190_v63 = vpop.f32.mrb[16].mxu1 }
 0x209   : > { %v3048_v0 = vpop.f32.mrb[17].mxu1  ;;  %v1241_v1 = vsel %vm1149_vm3, %v1190_v63, -inf }
 0x20a   : > { %1242 = vmax.xlane.f32.xlu1 %v1241_v1  ;;  %v1193_v3 = vpop.f32.mrb[18].mxu1 }
 0x20b   : > { %v3049_v4 = vpop.f32.mrb[19].mxu1  ;;  %v1244_v5 = vsel %vm1149_vm3, %v1193_v3, -inf }
 0x20c   : > { %1245 = vmax.xlane.f32.xlu0 %v1244_v5 }
 0x212   : > { %v1234_v6 = vpop.f32.mrb[4].mxu0 }
 0x213   : > { %v3054_v7 = vpop.f32.mrb[5].mxu0  ;;  %v1248_v8 = vsel %vm1247_vm4, %v1234_v6, -inf }
 0x214   : > { %v1237_v9 = vpop.f32.mrb[6].mxu0  ;;  %1249 = vmax.xlane.f32.xlu0 %v1248_v8 }
 0x215   : > { %v3055_v10 = vpop.f32.mrb[7].mxu0  ;;  %v1251_v11 = vsel %vm1247_vm4, %v1237_v9, -inf }
 0x216   : > { %1252 = vmax.xlane.f32.xlu1 %v1251_v11 }
 0x27b   : > { %v1427_v12 = vpop.f32.mrb[8].mxu0 }
 0x27c   : > { %v3072_v13 = vpop.f32.mrb[9].mxu0  ;;  %v1481_v15 = vsel %vm1149_vm3, %v1427_v12, -inf }
 0x27d   : > { %v3823_v16 = vpop.f32.mrb[10].mxu0  ;;  %1482 = vmax.xlane.f32.xlu0 %v1481_v15 }
 0x27e   : > { %v3073_v17 = vpop.f32.mrb[11].mxu0  ;;  %v1484_v18 = vsel %vm1149_vm3, %v3823_v16, -inf }
 0x27f   : > { %1485 = vmax.xlane.f32.xlu1 %v1484_v18 }
 0x285   : > { %v1474_v19 = vpop.f32.mrb[12].mxu0 }
 0x286   : > { %v3078_v20 = vpop.f32.mrb[13].mxu0  ;;  %v1487_v21 = vsel %vm1247_vm4, %v1474_v19, -inf }
 0x287   : > { %v1477_v22 = vpop.f32.mrb[14].mxu0  ;;  %1488 = vmax.xlane.f32.xlu0 %v1487_v21  ;;  %v873_v20 = vld [vmem:[%s3675_s30 + $0x4] sm:$0xf] }
 0x288   : > { %v3079_v23 = vpop.f32.mrb[15].mxu0  ;;  %v1490_v24 = vsel %vm1247_vm4, %v1477_v22, -inf  ;;  %v1630_v21 = vsel %vm1333_vm5, %v873_v20, 0 }
 0x289   : > { %1491 = vmax.xlane.f32.xlu1 %v1490_v24  ;;  %3093 = vmatpush3.bf16.msra.mxu0 %v1630_v21 }
 0x28a   : > { %3098 = vmatprep.subr.bf16.mxu0 %v3460_v2 }
 0x297   : > { %v1243_v28 = vpop.xlane.xlu1 %1242 }
 0x299   : > { %v1246_v26 = vpop.xlane.xlu0 %1245 }
 0x29a   : > { %1574 = vrot.lane.b32.xlu1 %v3829_v25, %s3462_s2 }
 0x29d   : > { %1526 = vrot.lane.b32.xlu0 %v3804_v57, %s3462_s2 }
 0x2a1   : > { %v1250_v29 = vpop.xlane.xlu0 %1249 }
 0x2a2   : > { %v1254_v30 = vmax.f32 %v1243_v28, %v1250_v29 }
 0x2a3   : > { %v1253_v31 = vpop.xlane.xlu1 %1252 }
 0x2a4   : > { %v1256_v33 = vsub.f32 %v1190_v63, %v1254_v30  ;;  %v1262_v34 = vsub.f32 %v1234_v6, %v1254_v30  ;;  %v1255_v35 = vmax.f32 %v1246_v26, %v1253_v31 }
 0x2a6   : > { %v1258_v36 = vmul.f32 1.442695, %v1256_v33  ;;  %v1264_v37 = vmul.f32 1.442695, %v1262_v34  ;;  %v1257_v38 = vsub.f32 %v1193_v3, %v1255_v35  ;;  %v1263_v39 = vsub.f32 %v1237_v9, %v1255_v35 }
 0x2a8   : > { %3303 = vpow2.f32 %v1258_v36  ;;  %v1260_v40 = vmul.f32 1.442695, %v1257_v38  ;;  %v1266_v42 = vmul.f32 1.442695, %v1263_v39 }
 0x2a9   : > { %3305 = vpow2.f32 %v1264_v37 }
 0x2aa   : > { %3307 = vpow2.f32 %v1260_v40 }
 0x2ab   : > { %3309 = vpow2.f32 %v1266_v42 }
 0x2b2   : > { %v3304_v43 = vpop.eup %3303 }
 0x2b3   : > { %v3306_v44 = vpop.eup %3305  ;;  %v1268_v17 = vsel %vm1149_vm3, %v3304_v43, 0.0 }
 0x2b4   : > { %v3308_v45 = vpop.eup %3307 }
 0x2b5   : > { %v3310_v46 = vpop.eup %3309  ;;  %v1284_v47 = vpack.c.bf16 %v3308_v45, %v3304_v43 }
 0x2b6   : > { %v1285_v48 = vpack.c.bf16 %v3310_v46, %v3306_v44  ;;  %v1277_v18 = vsel %vm1247_vm4, %v3310_v46, 0.0 }
 0x2b8   : > { %3059 = vmatmul.mubr.msk.bf16.vlgmr.msra.gmra.mrb[20].mxu1 %vm1247_vm4, %v1285_v48 }
 0x2b9   : > { %3063 = vmatpush3.bf16.msra.mxu1 %v1335_v49  ;;  %3064 = vmatprep.mubr.msk.bf16.mxu1 %vm3461_vm1, %v3460_v2 }
 0x2ba   : > { %3080 = vmatprep.subr.bf16.mxu1 %v3460_v2 }
 0x2c4   : > { %3065 = vmatmul.mubr.msk.bf16.vlgmr.msra.gmra.mrb[20].mxu1 %vm1149_vm3, %v1284_v47 }
 0x2c5   : > { %3082 = vmatprep.mubr.msk.bf16.mxu1 %vm3461_vm1, %v3460_v2 }
 0x30a   : > { %v1483_v50 = vpop.xlane.xlu0 %1482 }
 0x30c   : > { %v1486_v51 = vpop.xlane.xlu1 %1485 }
 0x314   : > { %v1489_v52 = vpop.xlane.xlu0 %1488 }
 0x315   : > { %v1493_v53 = vmax.f32 %v1483_v50, %v1489_v52 }
 0x316   : > { %v1492_v54 = vpop.xlane.xlu1 %1491 }
 0x317   : > { %v1495_v55 = vsub.f32 %v1427_v12, %v1493_v53  ;;  %v1501_v56 = vsub.f32 %v1474_v19, %v1493_v53  ;;  %v1494_v58 = vmax.f32 %v1486_v51, %v1492_v54  ;;  %v1271_v12 = vsel %vm1149_vm3, %v3308_v45, 0.0 }
 0x318   : > { %v1527_v59 = vpop.permute.xlu0 %1526  ;;  %v1274_v19 = vsel %vm1247_vm4, %v3306_v44, 0.0 }
 0x319   : > { %v1497_v60 = vmul.f32 1.442695, %v1495_v55  ;;  %v1503_v61 = vmul.f32 1.442695, %v1501_v56  ;;  %v1496_v62 = vsub.f32 %v3823_v16, %v1494_v58  ;;  %v1502_v63 = vsub.f32 %v1477_v22, %v1494_v58  ;;  %3081 = vmatpush3.bf16.msra.mxu1 %v1527_v59  ;;  %v872_v58 = vld [vmem:[%s3675_s30] sm:$0xf] }
 0x31a   : > { %3086 = vmatprep.subr.bf16.mxu1 %v3460_v2  ;;  %v1575_v9 = vpop.permute.xlu1 %1574 }
 0x31b   : > { %3311 = vpow2.f32 %v1497_v60  ;;  %v1499_v0 = vmul.f32 1.442695, %v1496_v62  ;;  %v1505_v1 = vmul.f32 1.442695, %v1502_v63  ;;  %v1580_v13 = vsel %vm1333_vm5, %v1575_v9, 0 }
 0x31c   : > { %3313 = vpow2.f32 %v1503_v61  ;;  %v1677_v62 = vsel %vm1333_vm5, %v872_v58, 0 }
 0x31d   : > { %3315 = vpow2.f32 %v1499_v0 }
 0x31e   : > { %3317 = vpow2.f32 %v1505_v1 }
 0x325   : > { %v3312_v3 = vpop.eup %3311 }
 0x326   : > { %v3314_v4 = vpop.eup %3313  ;;  %v1507_v5 = vsel %vm1149_vm3, %v3312_v3, 0.0 }
 0x327   : > { %v3316_v6 = vpop.eup %3315  ;;  %v1513_v7 = vsel %vm1247_vm4, %v3314_v4, 0.0  ;;  %1508 = vadd.xlane.f32.xlu1 %v1507_v5 }
 0x328   : > { %v3318_v8 = vpop.eup %3317  ;;  %1514 = vadd.xlane.f32.xlu0 %v1513_v7  ;;  %v1523_v10 = vpack.c.bf16 %v3316_v6, %v3312_v3  ;;  %v1510_v15 = vsel %vm1149_vm3, %v3316_v6, 0.0 }
 0x329   : > { %v1524_v11 = vpack.c.bf16 %v3318_v8, %v3314_v4  ;;  %v1516_v16 = vsel %vm1247_vm4, %v3318_v8, 0.0 }
 0x32b   : > { %3083 = vmatmul.mubr.msk.bf16.vlgmr.msra.gmra.mrb[24].mxu1 %vm1247_vm4, %v1524_v11  ;;  %1272 = vadd.xlane.f32.xlu1 %v1271_v12 }
 0x32c   : > { %3087 = vmatpush3.bf16.msra.mxu1 %v1580_v13  ;;  %1511 = vadd.xlane.f32.xlu0 %v1510_v15 }
 0x32d   : > { %3088 = vmatprep.mubr.msk.bf16.mxu1 %vm3461_vm1, %v3460_v2  ;;  %3104 = vmatprep.subr.bf16.mxu1 %v3460_v2 }
 0x32f   : > { %1517 = vadd.xlane.f32.xlu1 %v1516_v16 }
 0x330   : > { %1269 = vadd.xlane.f32.xlu0 %v1268_v17 }
 0x333   : > { %1278 = vadd.xlane.f32.xlu1 %v1277_v18 }
 0x334   : > { %1275 = vadd.xlane.f32.xlu0 %v1274_v19 }
 0x337   : > { %3089 = vmatmul.mubr.msk.bf16.vlgmr.msra.gmra.mrb[24].mxu1 %vm1149_vm3, %v1523_v10 }
 0x338   : > { %3106 = vmatprep.mubr.msk.bf16.mxu1 %vm3461_vm1, %v3460_v2 }
 0x344   : > { %1771 = vrot.lane.b32.xlu1 %v3783_v41, %s3463_s17 }
 0x348   : > { %1720 = vrot.lane.b32.xlu1 %v3772_v27, %s3463_s17 }
 0x34a   : > { %1722 = vrot.lane.b32.xlu0 %v3774_v32, %s3463_s17 }
 0x397   : > { %v1371_v22 = vpop.f32.mrb[20].mxu1 }
 0x398   : > { %v3066_v23 = vpop.f32.mrb[21].mxu1 }
 0x399   : > { %v1374_v24 = vpop.f32.mrb[22].mxu1 }
 0x39a   : > { %v3067_v26 = vpop.f32.mrb[23].mxu1 }
 0x3b4   : > { %v1509_v28 = vpop.xlane.xlu1 %1508 }
 0x3b5   : > { %v1515_v29 = vpop.xlane.xlu0 %1514 }
 0x3b6   : > { %v1519_v30 = vadd.f32 %v1515_v29, %v1509_v28 }
 0x3b8   : > { %v1273_v31 = vpop.xlane.xlu1 %1272 }
 0x3b9   : > { %v1512_v33 = vpop.xlane.xlu0 %1511 }
 0x3bc   : > { %v1518_v34 = vpop.xlane.xlu1 %1517 }
 0x3bd   : > { %v1270_v35 = vpop.xlane.xlu0 %1269  ;;  %v1520_v50 = vadd.f32 %v1518_v34, %v1512_v33 }
 0x3c0   : > { %v1279_v36 = vpop.xlane.xlu1 %1278 }
 0x3c1   : > { %v1281_v37 = vadd.f32 %v1279_v36, %v1273_v31  ;;  %v1276_v38 = vpop.xlane.xlu0 %1275 }
 0x3c2   : > { %v1280_v39 = vadd.f32 %v1276_v38, %v1270_v35 }
 0x3c3   : > { %3319 = vrcp.f32 %v1281_v37 }
 0x3c4   : > { %3321 = vrcp.f32 %v1280_v39  ;;  %v1772_v43 = vpop.permute.xlu1 %1771 }
 0x3c5   : > { %v1723_v40 = vpop.permute.xlu0 %1722  ;;  %3323 = vrcp.f32 %v1519_v30  ;;  %v1774_v63 = vsel %vm1149_vm3, %v1772_v43, 0 }
 0x3c6   : > { %v1728_v42 = vsel %vm1149_vm3, %v1723_v40, 0  ;;  %3325 = vrcp.f32 %v1520_v50 }
 0x3c7   : > { %3105 = vmatpush3.bf16.xpose.msra.mxu1 %v1728_v42 }
 0x3c8   : > { %3116 = vmatprep.subr.bf16.mxu1 %v3460_v2  ;;  %v1721_v45 = vpop.permute.xlu1 %1720 }
 0x3cd   : > { %v3320_v44 = vpop.eup %3319 }
 0x3ce   : > { %v3322_v46 = vpop.eup %3321  ;;  %v1379_v47 = vmul.f32 %v3320_v44, %v1374_v24  ;;  %3107 = vmatmul.mubr.msk.bf16.vlgmr.msra.gmra.mrb[28].mxu1 %vm1149_vm3, %v1721_v45 }
 0x3cf   : > { %v1378_v48 = vmul.f32 %v3322_v46, %v1371_v22  ;;  %3118 = vmatprep.mubr.msk.bf16.mxu1 %vm3461_vm1, %v3460_v2  ;;  %v3324_v51 = vpop.eup %3323 }
 0x3d0   : > { %v3326_v55 = vpop.eup %3325 }
 0x3d1   : > { %v1380_v49 = vpack.c.bf16 %v1379_v47, %v1378_v48 }
 0x40a   : > { %v1616_v52 = vpop.f32.mrb[24].mxu1 }
 0x40b   : > { %v1623_v53 = vmul.f32 %v3324_v51, %v1616_v52  ;;  %v3090_v54 = vpop.f32.mrb[25].mxu1 }
 0x40c   : > { %v1619_v56 = vpop.f32.mrb[26].mxu1 }
 0x40d   : > { %v1624_v59 = vmul.f32 %v3326_v55, %v1619_v56  ;;  %v3091_v60 = vpop.f32.mrb[27].mxu1  ;;  %v874_v55 = vld [vmem:[%s3675_s30 + $0x8] sm:$0xf] }
 0x40e   : > { %v1964_v56 = vsel %vm1333_vm5, %v874_v55, 0 }
 0x40f   : > { %v1625_v61 = vpack.c.bf16 %v1624_v59, %v1623_v53 }
 0x411   : > { %3095 = vmatmul.mubr.msk.bf16.vlgmr.msra.gmra.mrb[16].mxu0 %vm1149_vm3, %v1625_v61 }
 0x412   : > { %3099 = vmatpush3.bf16.msra.mxu0 %v1677_v62  ;;  %3100 = vmatprep.mubr.msk.bf16.mxu0 %vm3461_vm1, %v3460_v2 }
 0x413   : > { %3110 = vmatprep.subr.bf16.mxu0 %v3460_v2 }
 0x419   : > { %3101 = vmatmul.mubr.msk.bf16.vlgmr.msra.gmra.mrb[20].mxu0 %vm1149_vm3, %v1380_v49 }
 0x41a   : > { %3112 = vmatprep.mubr.msk.bf16.mxu0 %vm3461_vm1, %v3460_v2 }
 0x41b   : > { %3111 = vmatpush3.bf16.xpose.msra.mxu0 %v1774_v63 }
 0x41c   : > { %3128 = vmatprep.subr.bf16.mxu0 %v3460_v2 }
 0x422   : > { %3113 = vmatmul.mubr.msk.bf16.vlgmr.msra.gmra.mrb[24].mxu0 %vm1149_vm3, %v1721_v45 }
 0x423   : > { %3130 = vmatprep.mubr.msk.bf16.mxu0 %vm3461_vm1, %v3460_v2  ;;  %3129 = vmatpush3.bf16.msra.mxu0 %v1964_v56 }
 0x424   : > { %3134 = vmatprep.subr.bf16.mxu0 %v3460_v2 }
 0x4a1   : > { %v1764_v0 = vpop.f32.mrb[28].mxu1 }
 0x4a2   : > { %v3108_v1 = vpop.f32.mrb[29].mxu1  ;;  %v1817_v3 = vsel %vm1149_vm3, %v1764_v0, -inf }
 0x4a3   : > { %1818 = vmax.xlane.f32.xlu0 %v1817_v3  ;;  %v1767_v4 = vpop.f32.mrb[30].mxu1 }
 0x4a4   : > { %v3109_v5 = vpop.f32.mrb[31].mxu1  ;;  %v1820_v6 = vsel %vm1149_vm3, %v1767_v4, -inf }
 0x4a5   : > { %1821 = vmax.xlane.f32.xlu1 %v1820_v6 }
 0x4b6   : > { %1861 = vrot.lane.b32.xlu1 %v3804_v57, %s3463_s17 }
 0x4e4   : > { %v1666_v7 = vpop.f32.mrb[16].mxu0 }
 0x4e5   : > { %v3096_v8 = vpop.f32.mrb[17].mxu0 }
 0x4e6   : > { %v1669_v9 = vpop.f32.mrb[18].mxu0 }
 0x4e7   : > { %v3097_v10 = vpop.f32.mrb[19].mxu0 }
 0x4ec   : > { %v1713_v11 = vpop.f32.mrb[20].mxu0 }
 0x4ed   : > { %v3894_v12 = vadd.f32 %v1713_v11, %v1666_v7  ;;  %v3102_v13 = vpop.f32.mrb[21].mxu0 }
 0x4ee   : > { %v1716_v15 = vpop.f32.mrb[22].mxu0 }
 0x4ef   : > { %v3896_v16 = vadd.f32 %v1716_v15, %v1669_v9  ;;  %v3103_v17 = vpop.f32.mrb[23].mxu0 }
 0x4f5   : > { %v1810_v18 = vpop.f32.mrb[24].mxu0 }
 0x4f6   : > { %v3114_v19 = vpop.f32.mrb[25].mxu0  ;;  %v1823_v20 = vsel %vm1247_vm4, %v1810_v18, -inf }
 0x4f7   : > { %v1813_v21 = vpop.f32.mrb[26].mxu0  ;;  %1824 = vmax.xlane.f32.xlu0 %v1823_v20 }
 0x4f8   : > { %v3115_v22 = vpop.f32.mrb[27].mxu0  ;;  %v1826_v23 = vsel %vm1247_vm4, %v1813_v21, -inf }
 0x4fb   : > { %1827 = vmax.xlane.f32.xlu0 %v1826_v23 }
 0x511   : > { %1908 = vrot.lane.b32.xlu0 %v3829_v25, %s3463_s17 }
 0x530   : > { %v1819_v28 = vpop.xlane.xlu0 %1818 }
 0x532   : > { %v1822_v24 = vpop.xlane.xlu1 %1821 }
 0x536   : > { %v1862_v26 = vpop.permute.xlu1 %1861 }
 0x537   : > { %3117 = vmatpush3.bf16.msra.mxu1 %v1862_v26 }
 0x538   : > { %3122 = vmatprep.subr.bf16.mxu1 %v3460_v2 }
 0x584   : > { %v1825_v29 = vpop.xlane.xlu0 %1824 }
 0x585   : > { %v1829_v30 = vmax.f32 %v1819_v28, %v1825_v29 }
 0x587   : > { %v1831_v31 = vsub.f32 %v1764_v0, %v1829_v30  ;;  %v1837_v33 = vsub.f32 %v1810_v18, %v1829_v30 }
 0x588   : > { %v1828_v34 = vpop.xlane.xlu0 %1827 }
 0x589   : > { %v1833_v35 = vmul.f32 1.442695, %v1831_v31  ;;  %v1839_v36 = vmul.f32 1.442695, %v1837_v33  ;;  %v1830_v37 = vmax.f32 %v1822_v24, %v1828_v34 }
 0x58b   : > { %3327 = vpow2.f32 %v1833_v35  ;;  %v1832_v38 = vsub.f32 %v1767_v4, %v1830_v37  ;;  %v1838_v39 = vsub.f32 %v1813_v21, %v1830_v37 }
 0x58c   : > { %3329 = vpow2.f32 %v1839_v36  ;;  %v1909_v48 = vpop.permute.xlu0 %1908 }
 0x58d   : > { %v1835_v40 = vmul.f32 1.442695, %v1832_v38  ;;  %v1841_v42 = vmul.f32 1.442695, %v1838_v39  ;;  %v1914_v53 = vsel %vm1333_vm5, %v1909_v48, 0 }
 0x58f   : > { %3331 = vpow2.f32 %v1835_v40 }
 0x590   : > { %3333 = vpow2.f32 %v1841_v42 }
 0x595   : > { %v3328_v43 = vpop.eup %3327 }
 0x596   : > { %v1843_v44 = vsel %vm1149_vm3, %v3328_v43, 0.0  ;;  %v3330_v45 = vpop.eup %3329 }
 0x597   : > { %1844 = vadd.xlane.f32.xlu1 %v1843_v44  ;;  %v1849_v49 = vsel %vm1247_vm4, %v3330_v45, 0.0 }
 0x599   : > { %v3332_v46 = vpop.eup %3331 }
 0x59a   : > { %v3334_v47 = vpop.eup %3333  ;;  %v1846_v50 = vsel %vm1149_vm3, %v3332_v46, 0.0  ;;  %v1859_v51 = vpack.c.bf16 %v3332_v46, %v3328_v43 }
 0x59b   : > { %1850 = vadd.xlane.f32.xlu1 %v1849_v49  ;;  %1847 = vadd.xlane.f32.xlu0 %v1846_v50  ;;  %v1860_v52 = vpack.c.bf16 %v3334_v47, %v3330_v45  ;;  %v1852_v54 = vsel %vm1247_vm4, %v3334_v47, 0.0 }
 0x59d   : > { %3119 = vmatmul.mubr.msk.bf16.vlgmr.msra.gmra.mrb[32].mxu1 %vm1247_vm4, %v1860_v52 }
 0x59e   : > { %3123 = vmatpush3.bf16.msra.mxu1 %v1914_v53  ;;  %3124 = vmatprep.mubr.msk.bf16.mxu1 %vm3461_vm1, %v3460_v2 }
 0x59f   : > { %1853 = vadd.xlane.f32.xlu0 %v1852_v54  ;;  %3140 = vmatprep.subr.bf16.mxu1 %v3460_v2 }
 0x5a9   : > { %3125 = vmatmul.mubr.msk.bf16.vlgmr.msra.gmra.mrb[32].mxu1 %vm1149_vm3, %v1859_v51 }
 0x5aa   : > { %3142 = vmatprep.mubr.msk.bf16.mxu1 %vm3461_vm1, %v3460_v2 }
 0x5ac   : > { %2011 = vrot.lane.b32.xlu1 %v3774_v32, %s3464_s27 }
 0x5b0   : > { %2009 = vrot.lane.b32.xlu1 %v3772_v27, %s3464_s27 }
 0x5b5   : > { %2060 = vrot.lane.b32.xlu0 %v3783_v41, %s3464_s27 }
 0x624   : > { %v1845_v58 = vpop.xlane.xlu1 %1844 }
 0x628   : > { %v1848_v59 = vpop.xlane.xlu0 %1847  ;;  %v1851_v60 = vpop.xlane.xlu1 %1850 }
 0x629   : > { %v1855_v61 = vadd.f32 %v1851_v60, %v1845_v58 }
 0x62b   : > { %3335 = vrcp.f32 %v1855_v61  ;;  %v875_v61 = vld [vmem:[%s3675_s30 + $0xc] sm:$0xf] }
 0x62c   : > { %v1854_v62 = vpop.xlane.xlu0 %1853  ;;  %v2012_v1 = vpop.permute.xlu1 %2011 }
 0x62d   : > { %v1856_v63 = vadd.f32 %v1854_v62, %v1848_v59  ;;  %v2017_v11 = vsel %vm1149_vm3, %v2012_v1, 0  ;;  %v2253_v62 = vsel %vm1333_vm5, %v875_v61, 0 }
 0x62f   : > { %3337 = vrcp.f32 %v1856_v63 }
 0x630   : > { %v2061_v0 = vpop.permute.xlu0 %2060  ;;  %v2010_v27 = vpop.permute.xlu1 %2009 }
 0x631   : > { %v2063_v32 = vsel %vm1149_vm3, %v2061_v0, 0 }
 0x632   : > { %3141 = vmatpush3.bf16.xpose.msra.mxu1 %v2063_v32 }
 0x633   : > { %3158 = vmatprep.subr.bf16.mxu1 %v3460_v2 }
 0x635   : > { %v3336_v41 = vpop.eup %3335 }
 0x639   : > { %3143 = vmatmul.mubr.msk.bf16.vlgmr.msra.gmra.mrb[36].mxu1 %vm1149_vm3, %v2010_v27  ;;  %v3338_v6 = vpop.eup %3337 }
 0x63a   : > { %3160 = vmatprep.mubr.msk.bf16.mxu1 %vm3461_vm1, %v3460_v2  ;;  %3159 = vmatpush3.bf16.msra.mxu1 %v2253_v62 }
 0x63b   : > { %3164 = vmatprep.subr.bf16.mxu1 %v3460_v2 }
 0x67c   : > { %v1950_v3 = vpop.f32.mrb[32].mxu1 }
 0x67d   : > { %v1957_v4 = vmul.f32 %v3336_v41, %v1950_v3  ;;  %v3126_v5 = vpop.f32.mrb[33].mxu1 }
 0x67e   : > { %v1953_v7 = vpop.f32.mrb[34].mxu1 }
 0x67f   : > { %v1958_v8 = vmul.f32 %v3338_v6, %v1953_v7  ;;  %v3127_v9 = vpop.f32.mrb[35].mxu1 }
 0x681   : > { %v1959_v10 = vpack.c.bf16 %v1958_v8, %v1957_v4 }
 0x683   : > { %3131 = vmatmul.mubr.msk.bf16.vlgmr.msra.gmra.mrb[28].mxu0 %vm1149_vm3, %v1959_v10 }
 0x684   : > { %3135 = vmatpush3.bf16.xpose.msra.mxu0 %v2017_v11  ;;  %3136 = vmatprep.mubr.msk.bf16.mxu0 %vm3461_vm1, %v3460_v2 }
 0x685   : > { %3146 = vmatprep.subr.bf16.mxu0 %v3460_v2 }
 0x68b   : > { %3137 = vmatmul.mubr.msk.bf16.vlgmr.msra.gmra.mrb[32].mxu0 %vm1149_vm3, %v2010_v27 }
 0x68c   : > { %3148 = vmatprep.mubr.msk.bf16.mxu0 %vm3461_vm1, %v3460_v2 }
 0x70c   : > { %v2099_v13 = vpop.f32.mrb[36].mxu1 }
 0x70d   : > { %v3144_v15 = vpop.f32.mrb[37].mxu1  ;;  %v2112_v17 = vsel %vm1247_vm4, %v2099_v13, -inf }
 0x70e   : > { %2113 = vmax.xlane.f32.xlu0 %v2112_v17  ;;  %v2102_v18 = vpop.f32.mrb[38].mxu1 }
 0x70f   : > { %v3145_v19 = vpop.f32.mrb[39].mxu1  ;;  %v2115_v35 = vsel %vm1247_vm4, %v2102_v18, -inf }
 0x756   : > { %v2000_v20 = vpop.f32.mrb[28].mxu0 }
 0x757   : > { %v3939_v21 = vadd.f32 %v2000_v20, %v3894_v12  ;;  %v3132_v22 = vpop.f32.mrb[29].mxu0 }
 0x758   : > { %v2003_v23 = vpop.f32.mrb[30].mxu0  ;;  %v3363_v22 = vld [vmem:[#allocation2] sm:$0xff] }
 0x759   : > { %v3942_v24 = vadd.f32 %v2003_v23, %v3896_v16  ;;  %v3133_v26 = vpop.f32.mrb[31].mxu0  ;;  %v2304_v23 = vunpack.c.l.bf16 %v3363_v22 }
 0x75e   : > { %v2053_v28 = vpop.f32.mrb[32].mxu0 }
 0x75f   : > { %v3138_v29 = vpop.f32.mrb[33].mxu0  ;;  %v2106_v30 = vsel %vm1149_vm3, %v2053_v28, -inf }
 0x760   : > { %2107 = vmax.xlane.f32.xlu1 %v2106_v30  ;;  %v2056_v31 = vpop.f32.mrb[34].mxu0 }
 0x761   : > { %v3139_v33 = vpop.f32.mrb[35].mxu0  ;;  %v2109_v34 = vsel %vm1149_vm3, %v2056_v31, -inf }
 0x762   : > { %2110 = vmax.xlane.f32.xlu0 %v2109_v34 }
 0x764   : > { %2116 = vmax.xlane.f32.xlu1 %v2115_v35 }
 0x775   : > { %2197 = vrot.lane.b32.xlu1 %v3829_v25, %s3464_s27 }
 0x778   : > { %2150 = vrot.lane.b32.xlu0 %v3804_v57, %s3464_s27 }
 0x79b   : > { %v2114_v12 = vpop.xlane.xlu0 %2113 }
 0x7ed   : > { %v2108_v16 = vpop.xlane.xlu1 %2107 }
 0x7ee   : > { %v2118_v36 = vmax.f32 %v2108_v16, %v2114_v12 }
 0x7ef   : > { %v2111_v37 = vpop.xlane.xlu0 %2110 }
 0x7f0   : > { %v2120_v38 = vsub.f32 %v2053_v28, %v2118_v36  ;;  %v2126_v39 = vsub.f32 %v2099_v13, %v2118_v36  ;;  %v882_v13 = vld [vmem:[%s4198_s12] sm:$0x1] }
 0x7f1   : > { %v2117_v40 = vpop.xlane.xlu1 %2116  ;;  %v883_v15 = vunpack.c.l.bf16 %v882_v13 }
 0x7f2   : > { %v2122_v42 = vmul.f32 1.442695, %v2120_v38  ;;  %v2119_v43 = vmax.f32 %v2111_v37, %v2117_v40  ;;  %v2128_v44 = vmul.f32 1.442695, %v2126_v39 }
 0x7f3   : > { %v2151_v45 = vpop.permute.xlu0 %2150  ;;  %v2301_v17 = vrot.slane %v883_v15, %v3763_v14 }
 0x7f4   : > { %3339 = vpow2.f32 %v2122_v42  ;;  %v2121_v46 = vsub.f32 %v2056_v31, %v2119_v43  ;;  %v2127_v47 = vsub.f32 %v2102_v18, %v2119_v43  ;;  %3147 = vmatpush3.bf16.msra.mxu0 %v2151_v45  ;;  %v2305_v31 = vunpack.c.h.bf16 %v3363_v22  ;;  %v3293_v45 = vld [vmem:[%s3692_s20] sm:$0xff]  }
 0x7f5   : > { %3152 = vmatprep.subr.bf16.mxu0 %v3460_v2  ;;  %3341 = vpow2.f32 %v2128_v44  ;;  %v2198_v53 = vpop.permute.xlu1 %2197 }
 0x7f6   : > { %v2124_v25 = vmul.f32 1.442695, %v2121_v46  ;;  %v2130_v48 = vmul.f32 1.442695, %v2127_v47  ;;  %v2203_v59 = vsel %vm1333_vm5, %v2198_v53, 0  ;;  %v3294_v46 = vld [vmem:[%s3692_s20 + $0x8] sm:$0xff]  }
 0x7f7   : > { %v2310_v53 = vld [vmem:[%s4201_s23] sm:$0x1] }
 0x7f8   : > { %3343 = vpow2.f32 %v2124_v25 }
 0x7f9   : > { %3345 = vpow2.f32 %v2130_v48 }
 0x7fe   : > { %v3340_v57 = vpop.eup %3339 }
 0x7ff   : > { %v2132_v49 = vsel %vm1149_vm3, %v3340_v57, 0.0  ;;  %v3342_v50 = vpop.eup %3341 }
 0x800   : > { %2133 = vadd.xlane.f32.xlu1 %v2132_v49  ;;  %v2138_v60 = vsel %vm1247_vm4, %v3342_v50, 0.0 }
 0x802   : > { %v3344_v51 = vpop.eup %3343 }
 0x803   : > { %v3346_v52 = vpop.eup %3345  ;;  %v2135_v54 = vsel %vm1149_vm3, %v3344_v51, 0.0  ;;  %v2148_v55 = vpack.c.bf16 %v3344_v51, %v3340_v57  ;;  %v2308_v51 = vld [vmem:[%s4199_s24] sm:$0x1] }
 0x804   : > { %v2141_v56 = vsel %vm1247_vm4, %v3346_v52, 0.0  ;;  %2136 = vadd.xlane.f32.xlu0 %v2135_v54  ;;  %v2149_v58 = vpack.c.bf16 %v3346_v52, %v3342_v50  ;;  %v2309_v52 = vunpack.c.l.bf16 %v2308_v51 }
 0x805   : > { %2142 = vadd.xlane.f32.xlu1 %v2141_v56 }
 0x806   : > { %3149 = vmatmul.mubr.msk.bf16.vlgmr.msra.gmra.mrb[36].mxu0 %vm1247_vm4, %v2149_v58  ;;  %v2342_v54 = vrot.slane %v2309_v52, %v3763_v14 }
 0x807   : > { %3153 = vmatpush3.bf16.msra.mxu0 %v2203_v59  ;;  %3154 = vmatprep.mubr.msk.bf16.mxu0 %vm3461_vm1, %v3460_v2 }
 0x808   : > { %2139 = vadd.xlane.f32.xlu0 %v2138_v60  ;;  %3172 = vmatprep.subr.bf16.mxu0 %v3460_v2 }
 0x812   : > { %3155 = vmatmul.mubr.msk.bf16.vlgmr.msra.gmra.mrb[36].mxu0 %vm1149_vm3, %v2148_v55  ;;  %v2311_v55 = vunpack.c.l.bf16 %v2310_v53 }
 0x813   : > { %3188 = vmatprep.mubr.msk.bf16.mxu0 %vm3461_vm1, %v3460_v2 }
 0x814   : > { %v2348_v62 = vrot.slane %v2311_v55, %v3763_v14 }
 0x88d   : > { %v2134_v63 = vpop.xlane.xlu1 %2133 }
 0x891   : > { %v2137_v0 = vpop.xlane.xlu0 %2136 }
 0x892   : > { %v2143_v32 = vpop.xlane.xlu1 %2142 }
 0x893   : > { %v2145_v27 = vadd.f32 %v2143_v32, %v2137_v0 }
 0x895   : > { %v2140_v1 = vpop.xlane.xlu0 %2139  ;;  %3347 = vrcp.f32 %v2145_v27  ;;  %v3295_v27 = vld [vmem:[%s3706_s1] sm:$0xff]  }
 0x896   : > { %v2144_v41 = vadd.f32 %v2140_v1, %v2134_v63  ;;  %3173 = vmatpush3.bf16.msra.mxu0 %v3295_v27 }
 0x897   : > { %3174 = vmatprep.subr.bf16.mxu0 %v3460_v2 }
 0x898   : > { %3349 = vrcp.f32 %v2144_v41  ;;  %v3296_v41 = vld [vmem:[%s3706_s1 + $0x8] sm:$0xff]  }
 0x89a   : > { %3175 = vmatpush3.bf16.msra.mxu0 %v3296_v41 }
 0x89b   : > { %3176 = vmatprep.subr.bf16.mxu0 %v3460_v2 }
 0x89f   : > { %v3348_v4 = vpop.eup %3347 }
 0x8a2   : > { %v3350_v6 = vpop.eup %3349 }
 0x8e5   : > { %v2239_v3 = vpop.f32.mrb[36].mxu0 }
 0x8e6   : > { %v3156_v5 = vpop.f32.mrb[37].mxu0  ;;  %v2246_v8 = vmul.f32 %v3350_v6, %v2239_v3  ;;  %v3297_v3 = vld [vmem:[%s3706_s1 + $0x10] sm:$0xff]   ;;  %v3300_v6 = vld [vmem:[%s3706_s1 + $0x28] sm:$0xff]  }
 0x8e7   : > { %v2242_v7 = vpop.f32.mrb[38].mxu0  ;;  %3177 = vmatpush3.bf16.msra.mxu0 %v3297_v3  ;;  %v3299_v5 = vld [vmem:[%s3706_s1 + $0x20] sm:$0xff]  }
 0x8e8   : > { %v2247_v9 = vmul.f32 %v3348_v4, %v2242_v7  ;;  %v3157_v10 = vpop.f32.mrb[39].mxu0  ;;  %3178 = vmatprep.subr.bf16.mxu0 %v3460_v2  ;;  %v3298_v4 = vld [vmem:[%s3706_s1 + $0x18] sm:$0xff]   ;;  %v3301_v7 = vld [vmem:[%s3706_s1 + $0x30] sm:$0xff]   ;;  %v2550_v3 = vld [vmem:[%s839_s29] sm:$0x1]  ;;  %s4205_s29 = sld [smem:[#allocation9_spill]] }
 0x8ea   : > { %v2248_v11 = vpack.c.bf16 %v2247_v9, %v2246_v8  ;;  %v3302_v8 = vld [vmem:[%s3706_s1 + $0x38] sm:$0xff]   ;;  %v2356_v9 = vld [vmem:[%s828_s28] sm:$0x1] }
 0x8eb   : > { %3179 = vmatpush3.bf16.msra.mxu0 %v3298_v4  ;;  %v2357_v10 = vunpack.c.l.bf16 %v2356_v9  ;;  %v2551_v4 = vunpack.c.l.bf16 %v2550_v3 }
 0x8ec   : > { %3161 = vmatmul.mubr.msk.bf16.vlgmr.msra.gmra.mrb[40].mxu1 %vm1149_vm3, %v2248_v11  ;;  %3180 = vmatprep.subr.bf16.mxu0 %v3460_v2 }
 0x8ed   : > { %3168 = vmatprep.mubr.msk.bf16.mxu1 %vm3461_vm1, %v3460_v2  ;;  %3165 = vmatpush3.bf16.msra.mxu1 %v3293_v45  ;;  %v2361_v11 = vrot.slane %v2357_v10, %v3763_v14 }
 0x8ee   : > { %3166 = vmatprep.subr.bf16.mxu1 %v3460_v2  ;;  %p2920_p1 = scmp.ne.s32.totalorder %s4205_s29, 1 }
 0x8ef   : > { %3181 = vmatpush3.bf16.msra.mxu0 %v3299_v5  ;;  %v2552_v5 = vld [vmem:[%s842_s11] sm:$0x1]  ;;  %vm2605_vm6 = vcmask (!%p2920_p1), 257024  }
 0x8f0   : > { %3182 = vmatprep.subr.bf16.mxu0 %v3460_v2 }
 0x8f1   : > { %3167 = vmatpush3.bf16.msra.mxu1 %v3294_v46 }
 0x8f3   : > { %3183 = vmatpush3.bf16.msra.mxu0 %v3300_v6  ;;  %v2553_v6 = vunpack.c.l.bf16 %v2552_v5 }
 0x8f4   : > { %3184 = vmatprep.subr.bf16.mxu0 %v3460_v2 }
 0x8f7   : > { %3185 = vmatpush3.bf16.msra.mxu0 %v3301_v7  ;;  %v2583_v7 = vrot.slane %v2551_v4, %v3763_v14 }
 0x8f8   : > { %3186 = vmatprep.subr.bf16.mxu0 %v3460_v2 }
 0x8fb   : > { %3187 = vmatpush3.bf16.msra.mxu0 %v3302_v8 }
 0x9bf   : > { %v2289_v18 = vpop.f32.mrb[40].mxu1 }
 0x9c0   : > { %v2296_v19 = vadd.f32 %v2289_v18, %v3939_v21  ;;  %v3162_v20 = vpop.f32.mrb[41].mxu1 }
 0x9c1   : > { %v2292_v26 = vpop.f32.mrb[42].mxu1 }
 0x9c2   : > { %v2302_v28 = vadd.f32 %v2301_v17, %v2296_v19  ;;  %v2297_v29 = vadd.f32 %v2292_v26, %v3942_v24  ;;  %v3163_v30 = vpop.f32.mrb[43].mxu1 }
 0x9c4   : > { %v2303_v33 = vadd.f32 %v2301_v17, %v2297_v29  ;;  %v2306_v34 = vadd.f32 %v2304_v23, %v2302_v28 }
 0x9c6   : > { %v2312_v35 = vsel %vm900_vm2, %v2306_v34, 0.0  ;;  %v2307_v12 = vadd.f32 %v2305_v31, %v2303_v33 }
 0x9c7   : > { %2313 = vadd.xlane.f32.xlu0 %v2312_v35 }
 0x9c8   : > { %v2315_v16 = vsel %vm900_vm2, %v2307_v12, 0.0 }
 0x9c9   : > { %2316 = vadd.xlane.f32.xlu1 %v2315_v16 }
 0xa54   : > { %v2314_v21 = vpop.xlane.xlu0 %2313 }
 0xa55   : > { %v2319_v36 = vmul.f32 0.03125, %v2314_v21 }
 0xa56   : > { %v2317_v37 = vpop.xlane.xlu1 %2316 }
 0xa57   : > { %v2321_v38 = vsub.f32 %v2306_v34, %v2319_v36  ;;  %v2320_v39 = vmul.f32 0.03125, %v2317_v37 }
 0xa59   : > { %v2322_v40 = vsub.f32 %v2307_v12, %v2320_v39  ;;  %v2323_v24 = vmul.f32 %v2321_v38, %v2321_v38 }
 0xa5b   : > { %v2325_v42 = vsel %vm900_vm2, %v2323_v24, 0.0  ;;  %v2324_v43 = vmul.f32 %v2322_v40, %v2322_v40  ;;  %v2453_v24 = vld [vmem:[%s4202_s22] sm:$0x1] }
 0xa5c   : > { %2326 = vadd.xlane.f32.xlu0 %v2325_v42  ;;  %v2454_v42 = vunpack.c.l.bf16 %v2453_v24 }
 0xa5d   : > { %v2328_v44 = vsel %vm900_vm2, %v2324_v43, 0.0 }
 0xa5e   : > { %2329 = vadd.xlane.f32.xlu1 %v2328_v44  ;;  %v2458_v43 = vrot.slane %v2454_v42, %v3763_v14 }
 0xae9   : > { %v2327_v47 = vpop.xlane.xlu0 %2326 }
 0xaea   : > { %v2331_v25 = vmul.f32 0.03125, %v2327_v47 }
 0xaeb   : > { %v2330_v48 = vpop.xlane.xlu1 %2329 }
 0xaec   : > { %v2333_v57 = vadd.f32 1e-05, %v2331_v25  ;;  %v2332_v49 = vmul.f32 0.03125, %v2330_v48 }
 0xaee   : > { %3351 = vrsqrt.f32 %v2333_v57  ;;  %v2334_v50 = vadd.f32 1e-05, %v2332_v49 }
 0xaf0   : > { %3353 = vrsqrt.f32 %v2334_v50 }
 0xaf8   : > { %v3352_v56 = vpop.eup %3351 }
 0xaf9   : > { %v2337_v58 = vmul.f32 %v3352_v56, %v2321_v38 }
 0xafa   : > { %v3354_v59 = vpop.eup %3353 }
 0xafb   : > { %v2343_v60 = vmul.f32 %v2342_v54, %v2337_v58  ;;  %v2338_v61 = vmul.f32 %v3354_v59, %v2322_v40 }
 0xafd   : > { %v2344_v63 = vmul.f32 %v2342_v54, %v2338_v61  ;;  %v3997_v0 = vadd.f32 %v2348_v62, %v2343_v60 }
 0xaff   : > { %v3999_v32 = vadd.f32 %v2348_v62, %v2344_v63 }
 0xb01   : > { %v2351_v1 = vpack.c.bf16 %v3999_v32, %v3997_v0 }
 0xb03   : > { %3169 = vmatmul.mubr.msk.bf16.vlgmr.msra.gmra.mrb[44].mxu1 %vm900_vm2, %v2351_v1 }
 0xbd6   : > { %v2411_v13 = vpop.f32.mrb[44].mxu1 }
 0xbd7   : > { %v2412_v15 = vadd.f32 %v2411_v13, %v2361_v11  ;;  %v3170_v17 = vpop.f32.mrb[45].mxu1 }
 0xbd8   : > { %v2414_v18 = vpop.f32.mrb[46].mxu1 }
 0xbd9   : > { %v2420_v19 = vmul.f32 %v2412_v15, %v2412_v15  ;;  %v2415_v20 = vadd.f32 %v2414_v18, %v2361_v11  ;;  %v3171_v22 = vpop.f32.mrb[47].mxu1  ;;  %v2418_v21 = vmul.f32 0.5, %v2412_v15  ;;  %v2589_v11 = vrot.slane %v2553_v6, %v3763_v14 }
 0xbdb   : > { %v2422_v23 = vmul.f32 %v2420_v19, %v2412_v15  ;;  %v2421_v26 = vmul.f32 %v2415_v20, %v2415_v20  ;;  %v2419_v36 = vmul.f32 0.5, %v2415_v20 }
 0xbdd   : > { %v2424_v28 = vmul.f32 0.044715, %v2422_v23  ;;  %v2423_v2 = vmul.f32 %v2421_v26, %v2415_v20 }
 0xbdf   : > { %v2426_v29 = vadd.f32 %v2424_v28, %v2412_v15  ;;  %v2425_v30 = vmul.f32 0.044715, %v2423_v2 }
 0xbe1   : > { %v2428_v31 = vmul.f32 0.7978846, %v2426_v29  ;;  %v2427_v33 = vadd.f32 %v2425_v30, %v2415_v20 }
 0xbe3   : > { %3355 = vtanh.f32 %v2428_v31  ;;  %v2429_v34 = vmul.f32 0.7978846, %v2427_v33 }
 0xbe5   : > { %3357 = vtanh.f32 %v2429_v34 }
 0xbed   : > { %v3356_v35 = vpop.eup %3355 }
 0xbee   : > { %v2432_v12 = vadd.f32 1.0, %v3356_v35 }
 0xbef   : > { %v3358_v16 = vpop.eup %3357 }
 0xbf0   : > { %v2433_v37 = vadd.f32 1.0, %v3358_v16  ;;  %v2434_v38 = vmul.f32 %v2432_v12, %v2418_v21 }
 0xbf2   : > { %v2435_v39 = vmul.f32 %v2433_v37, %v2419_v36 }
 0xbf4   : > { %v2436_v40 = vpack.c.bf16 %v2435_v39, %v2434_v38 }
 0xbf6   : > { %3189 = vmatmul.mubr.bf16.vlgmr.msra.gmra.mrb[40].mxu0 %v2436_v40 }
 0xcc9   : > { %v2541_v44 = vpop.f32.mrb[40].mxu0 }
 0xcca   : > { %v2542_v45 = vadd.f32 %v2541_v44, %v2458_v43  ;;  %v3190_v46 = vpop.f32.mrb[41].mxu0 }
 0xccb   : > { %v2544_v47 = vpop.f32.mrb[42].mxu0 }
 0xccc   : > { %v2545_v25 = vadd.f32 %v2544_v47, %v2458_v43  ;;  %v3191_v48 = vpop.f32.mrb[43].mxu0  ;;  %v2548_v57 = vadd.f32 %v2542_v45, %v3997_v0 }
 0xcce   : > { %v2554_v49 = vsel %vm900_vm2, %v2548_v57, 0.0  ;;  %v2549_v50 = vadd.f32 %v2545_v25, %v3999_v32 }
 0xccf   : > { %2555 = vadd.xlane.f32.xlu0 %v2554_v49 }
 0xcd0   : > { %v2557_v51 = vsel %vm900_vm2, %v2549_v50, 0.0 }
 0xcd1   : > { %2558 = vadd.xlane.f32.xlu1 %v2557_v51 }
 0xd5c   : > { %v2556_v52 = vpop.xlane.xlu0 %2555 }
 0xd5d   : > { %v2560_v53 = vmul.f32 0.03125, %v2556_v52 }
 0xd5e   : > { %v2559_v54 = vpop.xlane.xlu1 %2558 }
 0xd5f   : > { %v2562_v55 = vsub.f32 %v2548_v57, %v2560_v53  ;;  %v2561_v56 = vmul.f32 0.03125, %v2559_v54 }
 0xd61   : > { %v2563_v58 = vsub.f32 %v2549_v50, %v2561_v56  ;;  %v2564_v59 = vmul.f32 %v2562_v55, %v2562_v55 }
 0xd63   : > { %v2566_v60 = vsel %vm900_vm2, %v2564_v59, 0.0  ;;  %v2565_v61 = vmul.f32 %v2563_v58, %v2563_v58 }
 0xd64   : > { %2567 = vadd.xlane.f32.xlu0 %v2566_v60 }
 0xd65   : > { %v2569_v62 = vsel %vm900_vm2, %v2565_v61, 0.0 }
 0xd66   : > { %2570 = vadd.xlane.f32.xlu1 %v2569_v62 }
 0xdf1   : > { %v2568_v63 = vpop.xlane.xlu0 %2567 }
 0xdf2   : > { %v2572_v0 = vmul.f32 0.03125, %v2568_v63 }
 0xdf3   : > { %v2571_v32 = vpop.xlane.xlu1 %2570 }
 0xdf4   : > { %v2574_v1 = vadd.f32 1e-05, %v2572_v0  ;;  %v2573_v27 = vmul.f32 0.03125, %v2571_v32 }
 0xdf6   : > { %3359 = vrsqrt.f32 %v2574_v1  ;;  %v2575_v41 = vadd.f32 1e-05, %v2573_v27 }
 0xdf8   : > { %3361 = vrsqrt.f32 %v2575_v41 }
 0xe00   : > { %v3360_v8 = vpop.eup %3359 }
 0xe01   : > { %v2578_v9 = vmul.f32 %v3360_v8, %v2562_v55 }
 0xe02   : > { %v3362_v10 = vpop.eup %3361 }
 0xe03   : > { %v2584_v13 = vmul.f32 %v2583_v7, %v2578_v9  ;;  %v2579_v15 = vmul.f32 %v3362_v10, %v2563_v58 }
 0xe05   : > { %v2585_v17 = vmul.f32 %v2583_v7, %v2579_v15  ;;  %v2590_v18 = vadd.f32 %v2589_v11, %v2584_v13  ;;  %2597 = sbr.rel (%p2920_p1) target bundleno = 3597 (0xe0d), region = 100 }
 0xe07   : > { %v2591_v19 = vadd.f32 %v2589_v11, %v2585_v17  ;;  %v2934_v22 = vpack.c.bf16 (!%p2920_p1), %v2590_v18, %v2590_v18 }
 0xe09   : > { %v2592_v20 = vpack.c.bf16 %v2591_v19, %v2590_v18  ;;  %v2935_v23 = vpack.c.bf16 (!%p2920_p1), %v2591_v19, %v2591_v19  ;;  %2606 = vst.msk [vmem:[%s3716_s3] sm:$0xf] (!%p2920_p1), %vm2605_vm6, %v2934_v22 }
 0xe0b   : > { %2593 = vst.msk [vmem:[#allocation2] sm:$0xff] %vm900_vm2, %v2592_v20 }
 0xe0c   : > { %2607 = vst.msk [vmem:[%s3716_s3 + $0x4] sm:$0xf] %vm2605_vm6, %v2935_v23 }
 0xe0d PF: > { %s4206_s11 = sld [smem:[#allocation10_spill]]  ;;  %s4207_s25 = sld [smem:[#allocation7_spill]] }
 0xe0e   : > { %s4209_s21 = sld [smem:[#allocation32_spill]]  ;;  %s2622_s16 = sshll.u32 %s3716_s3, 4  ;;  %s4060_s16 = int_to_ptr.vmem [resolvable:$true] %s2622_s16 }
 0xe0f   : > { %s3364_s2 = scalar_lea.vmem %s4060_s16, 128  ;;  %s3465_s28 = smov [#allocation3]  }
 0xe10   : > { %p3365_p2 = scmp.ne.s32.totalorder %s4060_s16, %s3364_s2  ;;  %s3368_s1 = sshll.u32 %s3465_s28, 4  ;;  %s3369_s1 = int_to_ptr.vmem [resolvable:$false] %s3368_s1 }
 0xe11   : > { %s3370_s22 = scalar_lea.vmem %s3369_s1, 256  ;;  %p3371_p6 = scmp.lt.s32.totalorder %s4060_s16, %s3369_s1 }
 0xe12   : > { %p3366_p4 = pnand %p3365_p2, %p3612_p3  ;;  %p3372_p7 = scmp.lt.s32.totalorder %s3370_s22, %s3364_s2 }
 0xe13   : > { %s2936_s4 = sshll.u32 %s4206_s11, 7  ;;  %s4210_s23 = sand.u32 1, %s4207_s25  }
 0xe14   : > { %s4057_s20 = scalar_lea.hbm %s4209_s21, %s2936_s4  ;;  %s4064_s26 = scalar_lea.sflag [#allocation4], %s4210_s23 }
 0xe15   : > { %p3367_p5 = pneg %p3366_p4  ;;  %p3373_p8 = por %p3372_p7, %p3371_p6 }
 0xe17   : > { %p3374_p10 = pnand %p3373_p8, %p3367_p5 }
 0xe19   : > { %3377 = shalt.err (!%p3374_p10)
}
 0xe1a   : > { %s3378_s3 = scalar_lea.hbm %s4057_s20, 128  ;;  %s3382_s17 = scalar_lea.hbm %s4209_s21, 256 }
 0xe1b   : > { %p3379_p11 = scmp.ne.s32.totalorder %s4057_s20, %s3378_s3  ;;  %p3383_p0 = scmp.lt.u32.totalorder %s4057_s20, %s4209_s21 }
 0xe1c   : > { %p3384_p1 = scmp.lt.u32.totalorder %s3382_s17, %s3378_s3  ;;  %p3386_p4 = scmp.lt.u32.totalorder %s3378_s3, %s4057_s20 }
 0xe1d   : > { %p3380_p12 = pnand %p3379_p11, %p3612_p3 }
 0xe1e   : > { %p3385_p2 = por %p3384_p1, %p3383_p0 }
 0xe1f   : > { %p3381_p13 = pneg %p3380_p12 }
 0xe20   : > { %p3387_p5 = por %p3386_p4, %p3385_p2 }
 0xe22   : > { %p3388_p6 = pnand %p3387_p5, %p3381_p13 }
 0xe24   : > { %3391 = shalt.err (!%p3388_p6)
}
 0xe25   : > { %s3466_s8 = smov 64   ;;  %s3467_s29 = smov 4  }
 0xe26   : > { %3208 = dma.vmem_to_hbm [thread:$0]  (%p3612_p3), %s4060_s16, 128, %s4057_s20, %s4064_s26, %s3466_s8, %s3466_s8, %s3467_s29  }
 0xe27 PF: > { %s4211_s11 = sld [smem:[#allocation13_spill]]  ;;  %s4212_s25 = sld [smem:[#allocation6_spill]] }
 0xe2d   : > { %p3214_p7 = scmp.ge.s32.totalorder %s4211_s11, 2  ;;  %s2637_s19 = sand.u32 1, %s4212_s25  }
 0xe2e   : > { %s2638_s24 = scalar_lea.sflag [#allocation4], %s2637_s19 }
 0xe2f   : > { %p3211_p8 = pnand %p3214_p7, %p3622_p9 }
 0xe31   : > { %3425 = dma.done.wait (!%p3211_p8), %s2638_s24, 128  }
 0xe32   : > { %3427 = vsyncadd (!%p3211_p8), %s2638_s24, 4294967168  ;;  %s31_s20 = sadd.s32 1, %s4211_s11   ;;  %s4214_s27 = sld [smem:[#allocation7_spill]] }
 0xe33   : > { %p28_p10 = scmp.ge.s32.totalorder %s31_s20, 6   ;;  %s4215_s28 = sld [smem:[#allocation8_spill]] }
 0xe34   : > { %s4216_s29 = sld [smem:[#allocation18_spill]]  ;;  %s4217_s30 = sld [smem:[#allocation11_spill]] }
 0xe35   : > { %s4218_s0 = sld [smem:[#allocation12_spill]]  ;;  %s4219_s19 = sld [smem:[#allocation14_spill]] }
 0xe36   : > { %s4220_s1 = sld [smem:[#allocation16_spill]]  ;;  %30 = sbr.rel (!%p28_p10) target bundleno = 17 (0x11), region = 183 }
 0xe3d   :  { %2643 = vsyncpa [#allocation4], 1 }
 0xe3e   :  { %2645 = vsyncpa [#allocation4 + $0x1], 1 }

</bundles_post_ra>
